<compile_context>
chip_gen: v7x
topology: tpu7x:2x2x1
jax: 0.10.0
libtpu: 0.0.40
codegen_flags: <defaults>
</compile_context>

<pallas_src>
import jax
import jax.numpy as jnp
from jax import lax
from jax.experimental import pallas as pl
from jax.experimental.pallas import tpu as pltpu


def _round_up(x, m):
    return ((x + m - 1) // m) * m


def _vmem_limit_bytes():
    # ~75% of physical VMEM, capped; fall back to a value safe on every gen.
    try:
        cap = int(pltpu.get_tpu_info().vmem_capacity_bytes)
    except Exception:
        cap = 64 << 20
    return int(min(cap * 3 // 4, 96 << 20))


# ----------------------------------------------------------------------------
# Pallas kernel: fused  out.T = relu(x @ w + b).T   (lane-dense store)
#   x_ref: (TM, Kp) bf16   w_ref: (Kp, N) bf16   b_ref: (1, N) f32
#   o_ref: (N, TM) f32  -- TM (multiple of 128) sits on the lane axis.
# ----------------------------------------------------------------------------
def _matmul_bias_relu_t_kernel(x_ref, w_ref, b_ref, o_ref):
    acc = jnp.dot(x_ref[...], w_ref[...], preferred_element_type=jnp.float32)
    acc = jnp.maximum(acc + b_ref[...], 0.0)          # bias (1, N) broadcasts
    o_ref[...] = acc.T.astype(o_ref.dtype)            # XLU transpose -> lane-dense store


def matmul_bias_relu_t(x, w, b, *, tm=512):
    """x: (M, K), w: (K, N), b: (N,) -> relu(x @ w + b).T of shape (N, M)."""
    M, K = x.shape
    K2, N = w.shape
    assert K == K2

    K_pad = _round_up(K, 128)
    TM = min(tm, _round_up(M, 128))
    M_pad = _round_up(M, TM)

    xp = jnp.pad(x.astype(jnp.bfloat16), ((0, M_pad - M), (0, K_pad - K)))
    wp = jnp.pad(w.astype(jnp.bfloat16), ((0, K_pad - K), (0, 0)))
    b2 = b.reshape(1, N).astype(jnp.float32)

    grid = (M_pad // TM,)
    out_t = pl.pallas_call(
        _matmul_bias_relu_t_kernel,
        out_shape=jax.ShapeDtypeStruct((N, M_pad), jnp.float32),
        grid=grid,
        in_specs=[
            pl.BlockSpec((TM, K_pad), lambda i: (i, 0)),
            pl.BlockSpec((K_pad, N), lambda i: (0, 0)),
            pl.BlockSpec((1, N), lambda i: (0, 0)),
        ],
        out_specs=pl.BlockSpec((N, TM), lambda i: (0, i)),
        compiler_params=pltpu.CompilerParams(
            dimension_semantics=("parallel",),
            vmem_limit_bytes=_vmem_limit_bytes(),
        ),
        cost_estimate=pl.CostEstimate(
            flops=2 * M_pad * K_pad * N,
            transcendentals=0,
            bytes_accessed=2 * (M_pad * K_pad + K_pad * N) + 4 * (N + N * M_pad),
        ),
    )(xp, wp, b2)
    return out_t[:, :M]                               # (N, M)


# ----------------------------------------------------------------------------
# im2col glue (plain JAX): NHWC input -> (N*OH*OW, k*k*Cin) patch matrix.
# Patch ordering is (kh, kw, Cin), matching the weight reshape below.
# ----------------------------------------------------------------------------
def _im2col(x_nhwc, k, stride):
    N, H, W, C = x_nhwc.shape
    OH = (H - k) // stride + 1
    OW = (W - k) // stride + 1
    patches = []
    for i in range(k):
        for j in range(k):
            patches.append(
                x_nhwc[:, i : i + stride * OH : stride, j : j + stride * OW : stride, :]
            )  # (N, OH, OW, C)
    p = jnp.stack(patches, axis=3)                    # (N, OH, OW, k*k, C)
    return p.reshape(N * OH * OW, k * k * C), (N, OH, OW)


def _conv2d_relu(x_nhwc, w_oihw, b, stride):
    """Valid-padding Conv2d + ReLU. w_oihw: (Cout, Cin, k, k). Returns NHWC."""
    Cout, Cin, k, _ = w_oihw.shape
    patches, (N, OH, OW) = _im2col(x_nhwc, k, stride)
    # (Cout, Cin, kh, kw) -> (kh, kw, Cin, Cout) -> (k*k*Cin, Cout)
    w_mat = jnp.transpose(w_oihw, (2, 3, 1, 0)).reshape(k * k * Cin, Cout)
    out_t = matmul_bias_relu_t(patches, w_mat, b)     # (Cout, N*OH*OW)
    out = out_t.reshape(Cout, N, OH, OW)
    return jnp.transpose(out, (1, 2, 3, 0))           # NHWC


# ----------------------------------------------------------------------------
# CNNEncoder forward (features_dim == 3136 architecture):
#   Conv(Cin->32, k8, s4) ReLU; Conv(32->64, k4, s2) ReLU; Conv(64->64, k3, s1)
#   ReLU; Flatten (channel-major, matching NCHW flatten in PyTorch).
# ----------------------------------------------------------------------------
def cnn_encoder_forward(x_nchw, params):
    x = jnp.transpose(x_nchw, (0, 2, 3, 1))           # NCHW -> NHWC
    x = _conv2d_relu(x, params["w1"], params["b1"], stride=4)
    x = _conv2d_relu(x, params["w2"], params["b2"], stride=2)
    x = _conv2d_relu(x, params["w3"], params["b3"], stride=1)
    # NHWC -> NCHW -> flatten, to match torch.nn.Flatten on NCHW tensors.
    x = jnp.transpose(x, (0, 3, 1, 2))
    N = x.shape[0]
    return x.reshape(N, -1)


def init_params(key, n_input_channels):
    ks = jax.random.split(key, 6)
    def w(k, shape, fan_in):
        return (jax.random.normal(k, shape, jnp.float32) / jnp.sqrt(fan_in)).astype(jnp.float32)
    return {
        "w1": w(ks[0], (32, n_input_channels, 8, 8), n_input_channels * 8 * 8),
        "b1": 0.01 * jax.random.normal(ks[1], (32,), jnp.float32),
        "w2": w(ks[2], (64, 32, 4, 4), 32 * 4 * 4),
        "b2": 0.01 * jax.random.normal(ks[3], (64,), jnp.float32),
        "w3": w(ks[4], (64, 64, 3, 3), 64 * 3 * 3),
        "b3": 0.01 * jax.random.normal(ks[5], (64,), jnp.float32),
    }


# Pure-JAX f32 reference (lax.conv) to validate the Pallas path.
def _reference_forward(x_nchw, params):
    dn = ("NCHW", "OIHW", "NCHW")
    x = x_nchw
    for w, b, s in ((params["w1"], params["b1"], 4),
                    (params["w2"], params["b2"], 2),
                    (params["w3"], params["b3"], 1)):
        x = lax.conv_general_dilated(x, w, (s, s), "VALID", dimension_numbers=dn)
        x = jnp.maximum(x + b[None, :, None, None], 0.0)
    return x.reshape(x.shape[0], -1)


if __name__ == "__main__":
    # Spatial 36 is the smallest size that survives k8/s4 -> k4/s2 -> k3/s1
    # valid convs (36 -> 8 -> 3 -> 1).
    batch, channels, spatial = 2, 4, 36
    key = jax.random.PRNGKey(0)
    k_x, k_p = jax.random.split(key)
    x = jax.random.normal(k_x, (batch, channels, spatial, spatial), jnp.float32)
    params = init_params(k_p, channels)

    fwd = jax.jit(cnn_encoder_forward)
    out = fwd(x, params)
    out = jax.block_until_ready(out)

    ref = _reference_forward(x, params)
    assert out.shape == (batch, 64 * 1 * 1), out.shape
    # bf16 operands (f32 accumulation) -> loosen tolerance vs. the f32 reference.
    assert jnp.allclose(out, ref, atol=5e-2, rtol=5e-2), (
        "mismatch vs reference: max abs err = "
        f"{float(jnp.max(jnp.abs(out - ref)))}"
    )

    print("KERNEL_OK")
</pallas_src>

<mosaic_0001>
module attributes {stable_mosaic.version = 11 : i64} {
  func.func @_matmul_bias_relu_t_kernel(%arg0: i32, %arg1: memref<128x256xbf16, #tpu.memory_space<vmem>>, %arg2: memref<256x32xbf16, #tpu.memory_space<vmem>>, %arg3: memref<1x32xf32, #tpu.memory_space<vmem>>, %arg4: memref<32x128xf32, #tpu.memory_space<vmem>>) attributes {dimension_semantics = [#tpu.dimension_semantics<parallel>], iteration_bounds = array<i64: 1>, scalar_prefetch = 0 : i64, scratch_operands = 0 : i64, tpu.core_type = #tpu.core_type<tc>, window_params = [{transform_indices = @transform_0, window_bounds = array<i64: 128, 256>}, {pipeline_mode = #tpu.pipeline_mode<synchronous>, transform_indices = @transform_1, window_bounds = array<i64: 256, 32>}, {pipeline_mode = #tpu.pipeline_mode<synchronous>, transform_indices = @transform_2, window_bounds = array<i64: 1, 32>}, {transform_indices = @transform_3, window_bounds = array<i64: 32, 128>}]} {
    %c0 = arith.constant 0 : index
    %c0_0 = arith.constant 0 : index
    %0 = vector.load %arg1[%c0, %c0_0] : memref<128x256xbf16, #tpu.memory_space<vmem>>, vector<128x256xbf16>
    %c0_1 = arith.constant 0 : index
    %c0_2 = arith.constant 0 : index
    %1 = vector.load %arg2[%c0_1, %c0_2] : memref<256x32xbf16, #tpu.memory_space<vmem>>, vector<256x32xbf16>
    %cst = arith.constant dense<0.000000e+00> : vector<128x32xf32>
    %2 = tpu.matmul %0, %1, %cst {dimension_numbers = #tpu.dot_dimension_numbers<[1], [0], [0], [1], [0, 0, 1, 1], [], []>} : vector<128x256xbf16>, vector<256x32xbf16>, vector<128x32xf32> -> vector<128x32xf32>
    %c0_3 = arith.constant 0 : index
    %c0_4 = arith.constant 0 : index
    %3 = vector.load %arg3[%c0_3, %c0_4] : memref<1x32xf32, #tpu.memory_space<vmem>>, vector<1x32xf32>
    %4 = vector.broadcast %3 : vector<1x32xf32> to vector<128x32xf32>
    %5 = arith.addf %2, %4 : vector<128x32xf32>
    %cst_5 = arith.constant 0.000000e+00 : f32
    %6 = vector.broadcast %cst_5 : f32 to vector<128x32xf32>
    %7 = arith.maximumf %5, %6 : vector<128x32xf32>
    %8 = tpu.transpose %7, [1, 0] : vector<128x32xf32> -> vector<32x128xf32>
    %c0_6 = arith.constant 0 : index
    %c0_7 = arith.constant 0 : index
    %9 = vector.load %arg4[%c0_6, %c0_7] : memref<32x128xf32, #tpu.memory_space<vmem>>, vector<32x128xf32>
    tpu.vector_store %arg4[%c0_6, %c0_7], %8 {strides = array<i32>} : memref<32x128xf32, #tpu.memory_space<vmem>>, vector<32x128xf32>,
    return
  }
  func.func @transform_0(%arg0: i32) -> (i32, i32) {
    %c0_i32 = arith.constant 0 : i32
    %c0_i32_0 = arith.constant 0 : i32
    return %arg0, %c0_i32 : i32, i32
  }
  func.func @transform_1(%arg0: i32) -> (i32, i32) {
    %c0_i32 = arith.constant 0 : i32
    %c0_i32_0 = arith.constant 0 : i32
    %c0_i32_1 = arith.constant 0 : i32
    return %c0_i32, %c0_i32_0 : i32, i32
  }
  func.func @transform_2(%arg0: i32) -> (i32, i32) {
    %c0_i32 = arith.constant 0 : i32
    %c0_i32_0 = arith.constant 0 : i32
    %c0_i32_1 = arith.constant 0 : i32
    return %c0_i32, %c0_i32_0 : i32, i32
  }
  func.func @transform_3(%arg0: i32) -> (i32, i32) {
    %c0_i32 = arith.constant 0 : i32
    %c0_i32_0 = arith.constant 0 : i32
    return %c0_i32, %arg0 : i32, i32
  }
}

module attributes {stable_mosaic.version = 11 : i64} {
  func.func @_matmul_bias_relu_t_kernel(%arg0: i32, %arg1: memref<128x512xbf16, #tpu.memory_space<vmem>>, %arg2: memref<512x64xbf16, #tpu.memory_space<vmem>>, %arg3: memref<1x64xf32, #tpu.memory_space<vmem>>, %arg4: memref<64x128xf32, #tpu.memory_space<vmem>>) attributes {dimension_semantics = [#tpu.dimension_semantics<parallel>], iteration_bounds = array<i64: 1>, scalar_prefetch = 0 : i64, scratch_operands = 0 : i64, tpu.core_type = #tpu.core_type<tc>, window_params = [{transform_indices = @transform_0, window_bounds = array<i64: 128, 512>}, {pipeline_mode = #tpu.pipeline_mode<synchronous>, transform_indices = @transform_1, window_bounds = array<i64: 512, 64>}, {pipeline_mode = #tpu.pipeline_mode<synchronous>, transform_indices = @transform_2, window_bounds = array<i64: 1, 64>}, {transform_indices = @transform_3, window_bounds = array<i64: 64, 128>}]} {
    %c0 = arith.constant 0 : index
    %c0_0 = arith.constant 0 : index
    %0 = vector.load %arg1[%c0, %c0_0] : memref<128x512xbf16, #tpu.memory_space<vmem>>, vector<128x512xbf16>
    %c0_1 = arith.constant 0 : index
    %c0_2 = arith.constant 0 : index
    %1 = vector.load %arg2[%c0_1, %c0_2] : memref<512x64xbf16, #tpu.memory_space<vmem>>, vector<512x64xbf16>
    %cst = arith.constant dense<0.000000e+00> : vector<128x64xf32>
    %2 = tpu.matmul %0, %1, %cst {dimension_numbers = #tpu.dot_dimension_numbers<[1], [0], [0], [1], [0, 0, 1, 1], [], []>} : vector<128x512xbf16>, vector<512x64xbf16>, vector<128x64xf32> -> vector<128x64xf32>
    %c0_3 = arith.constant 0 : index
    %c0_4 = arith.constant 0 : index
    %3 = vector.load %arg3[%c0_3, %c0_4] : memref<1x64xf32, #tpu.memory_space<vmem>>, vector<1x64xf32>
    %4 = vector.broadcast %3 : vector<1x64xf32> to vector<128x64xf32>
    %5 = arith.addf %2, %4 : vector<128x64xf32>
    %cst_5 = arith.constant 0.000000e+00 : f32
    %6 = vector.broadcast %cst_5 : f32 to vector<128x64xf32>
    %7 = arith.maximumf %5, %6 : vector<128x64xf32>
    %8 = tpu.transpose %7, [1, 0] : vector<128x64xf32> -> vector<64x128xf32>
    %c0_6 = arith.constant 0 : index
    %c0_7 = arith.constant 0 : index
    %9 = vector.load %arg4[%c0_6, %c0_7] : memref<64x128xf32, #tpu.memory_space<vmem>>, vector<64x128xf32>
    tpu.vector_store %arg4[%c0_6, %c0_7], %8 {strides = array<i32>} : memref<64x128xf32, #tpu.memory_space<vmem>>, vector<64x128xf32>,
    return
  }
  func.func @transform_0(%arg0: i32) -> (i32, i32) {
    %c0_i32 = arith.constant 0 : i32
    %c0_i32_0 = arith.constant 0 : i32
    return %arg0, %c0_i32 : i32, i32
  }
  func.func @transform_1(%arg0: i32) -> (i32, i32) {
    %c0_i32 = arith.constant 0 : i32
    %c0_i32_0 = arith.constant 0 : i32
    %c0_i32_1 = arith.constant 0 : i32
    return %c0_i32, %c0_i32_0 : i32, i32
  }
  func.func @transform_2(%arg0: i32) -> (i32, i32) {
    %c0_i32 = arith.constant 0 : i32
    %c0_i32_0 = arith.constant 0 : i32
    %c0_i32_1 = arith.constant 0 : i32
    return %c0_i32, %c0_i32_0 : i32, i32
  }
  func.func @transform_3(%arg0: i32) -> (i32, i32) {
    %c0_i32 = arith.constant 0 : i32
    %c0_i32_0 = arith.constant 0 : i32
    return %c0_i32, %arg0 : i32, i32
  }
}

module attributes {stable_mosaic.version = 11 : i64} {
  func.func @_matmul_bias_relu_t_kernel(%arg0: i32, %arg1: memref<128x640xbf16, #tpu.memory_space<vmem>>, %arg2: memref<640x64xbf16, #tpu.memory_space<vmem>>, %arg3: memref<1x64xf32, #tpu.memory_space<vmem>>, %arg4: memref<64x128xf32, #tpu.memory_space<vmem>>) attributes {dimension_semantics = [#tpu.dimension_semantics<parallel>], iteration_bounds = array<i64: 1>, scalar_prefetch = 0 : i64, scratch_operands = 0 : i64, tpu.core_type = #tpu.core_type<tc>, window_params = [{transform_indices = @transform_0, window_bounds = array<i64: 128, 640>}, {pipeline_mode = #tpu.pipeline_mode<synchronous>, transform_indices = @transform_1, window_bounds = array<i64: 640, 64>}, {pipeline_mode = #tpu.pipeline_mode<synchronous>, transform_indices = @transform_2, window_bounds = array<i64: 1, 64>}, {transform_indices = @transform_3, window_bounds = array<i64: 64, 128>}]} {
    %c0 = arith.constant 0 : index
    %c0_0 = arith.constant 0 : index
    %0 = vector.load %arg1[%c0, %c0_0] : memref<128x640xbf16, #tpu.memory_space<vmem>>, vector<128x640xbf16>
    %c0_1 = arith.constant 0 : index
    %c0_2 = arith.constant 0 : index
    %1 = vector.load %arg2[%c0_1, %c0_2] : memref<640x64xbf16, #tpu.memory_space<vmem>>, vector<640x64xbf16>
    %cst = arith.constant dense<0.000000e+00> : vector<128x64xf32>
    %2 = tpu.matmul %0, %1, %cst {dimension_numbers = #tpu.dot_dimension_numbers<[1], [0], [0], [1], [0, 0, 1, 1], [], []>} : vector<128x640xbf16>, vector<640x64xbf16>, vector<128x64xf32> -> vector<128x64xf32>
    %c0_3 = arith.constant 0 : index
    %c0_4 = arith.constant 0 : index
    %3 = vector.load %arg3[%c0_3, %c0_4] : memref<1x64xf32, #tpu.memory_space<vmem>>, vector<1x64xf32>
    %4 = vector.broadcast %3 : vector<1x64xf32> to vector<128x64xf32>
    %5 = arith.addf %2, %4 : vector<128x64xf32>
    %cst_5 = arith.constant 0.000000e+00 : f32
    %6 = vector.broadcast %cst_5 : f32 to vector<128x64xf32>
    %7 = arith.maximumf %5, %6 : vector<128x64xf32>
    %8 = tpu.transpose %7, [1, 0] : vector<128x64xf32> -> vector<64x128xf32>
    %c0_6 = arith.constant 0 : index
    %c0_7 = arith.constant 0 : index
    %9 = vector.load %arg4[%c0_6, %c0_7] : memref<64x128xf32, #tpu.memory_space<vmem>>, vector<64x128xf32>
    tpu.vector_store %arg4[%c0_6, %c0_7], %8 {strides = array<i32>} : memref<64x128xf32, #tpu.memory_space<vmem>>, vector<64x128xf32>,
    return
  }
  func.func @transform_0(%arg0: i32) -> (i32, i32) {
    %c0_i32 = arith.constant 0 : i32
    %c0_i32_0 = arith.constant 0 : i32
    return %arg0, %c0_i32 : i32, i32
  }
  func.func @transform_1(%arg0: i32) -> (i32, i32) {
    %c0_i32 = arith.constant 0 : i32
    %c0_i32_0 = arith.constant 0 : i32
    %c0_i32_1 = arith.constant 0 : i32
    return %c0_i32, %c0_i32_0 : i32, i32
  }
  func.func @transform_2(%arg0: i32) -> (i32, i32) {
    %c0_i32 = arith.constant 0 : i32
    %c0_i32_0 = arith.constant 0 : i32
    %c0_i32_1 = arith.constant 0 : i32
    return %c0_i32, %c0_i32_0 : i32, i32
  }
  func.func @transform_3(%arg0: i32) -> (i32, i32) {
    %c0_i32 = arith.constant 0 : i32
    %c0_i32_0 = arith.constant 0 : i32
    return %c0_i32, %arg0 : i32, i32
  }
}

</mosaic_0001>

<bundles_post_ra>
// kernel: cnn_encoder_forward.3
= control target key start
LH: loop header
LB: loop body
LE: loop exit
PB: predicated region body
PF: predicated region fallthrough
CT: control target
= control target key end

     0   :  { %s704_s1 = inlined_call_operand.vmem [shape: bf16[256,32], index: 1, kind: input, shape index: {}]   ;;  %s705_s0 = inlined_call_operand.vmem [shape: bf16[128,256], index: 0, kind: input, shape index: {}]   ;;  %s706_s2 = inlined_call_operand.vmem [shape: f32[1,32], index: 2, kind: input, shape index: {}]   ;;  %s707_s3 = inlined_call_operand.vmem [shape: f32[32,128], index: 3, kind: output, shape index: {}]  }
   0x1   :  { %v512_v0 = vld [vmem:[%s704_s1 + $0x40] sm:$0xff]   ;;  %v514_v2 = vld [vmem:[%s704_s1 + $0x48] sm:$0xff]   ;;  %v516_v4 = vld [vmem:[%s704_s1 + $0x50] sm:$0xff]  }
   0x2   :  { %v513_v1 = vld [vmem:[%s704_s1] sm:$0xff]   ;;  %432 = vmatprep.subr.bf16.mxu0 %v512_v0  ;;  %496 = vmatprep.subr.bf16.mxu1 %v512_v0  ;;  %v515_v3 = vld [vmem:[%s704_s1 + $0x8] sm:$0xff]   ;;  %v517_v5 = vld [vmem:[%s704_s1 + $0x10] sm:$0xff]  }
   0x3   :  { %433 = vmatpush3.bf16.msra.mxu0 %v513_v1  ;;  %504 = vmatpush3.bf16.msra.mxu1 %v513_v1  ;;  %v518_v6 = vld [vmem:[%s704_s1 + $0x58] sm:$0xff]   ;;  %v520_v8 = vld [vmem:[%s704_s1 + $0x60] sm:$0xff]   ;;  %v522_v10 = vld [vmem:[%s704_s1 + $0x68] sm:$0xff]  }
   0x4   :  { %434 = vmatprep.subr.bf16.mxu0 %v514_v2  ;;  %497 = vmatprep.subr.bf16.mxu1 %v514_v2  ;;  %v519_v7 = vld [vmem:[%s704_s1 + $0x18] sm:$0xff]   ;;  %v521_v9 = vld [vmem:[%s704_s1 + $0x20] sm:$0xff]   ;;  %v523_v12 = vld [vmem:[%s704_s1 + $0x28] sm:$0xff]  }
   0x5   :  { %v530_v11 = vld [vmem:[%s705_s0 + $0x4] ss:$8 sps:$4 sm:$0xff]   ;;  %v524_v13 = vld [vmem:[%s704_s1 + $0x70] sm:$0xff]   ;;  %v526_v16 = vld [vmem:[%s704_s1 + $0x78] sm:$0xff]  }
   0x6   :  { %278 = vmatprep.mubr.bf16.mxu0 %v530_v11  ;;  %v542_v14 = vld [vmem:[%s705_s0 + $0x44] ss:$8 sps:$4 sm:$0xff]   ;;  %v525_v15 = vld [vmem:[%s704_s1 + $0x30] sm:$0xff]   ;;  %v527_v17 = vld [vmem:[%s704_s1 + $0x38] sm:$0xff]  }
   0x7   :  { %435 = vmatpush3.bf16.msra.mxu0 %v515_v3  ;;  %505 = vmatpush3.bf16.msra.mxu1 %v515_v3  ;;  %v528_v18 = vld [vmem:[%s705_s0] ss:$8 sps:$4 sm:$0xff]   ;;  %v531_v19 = vld [vmem:[%s705_s0 + $0x14] ss:$8 sps:$4 sm:$0xff]   ;;  %v533_v22 = vld [vmem:[%s705_s0 + $0x10] ss:$8 sps:$4 sm:$0xff]  }
   0x8   :  { %436 = vmatprep.subr.bf16.mxu0 %v516_v4  ;;  %498 = vmatprep.subr.bf16.mxu1 %v516_v4  ;;  %v540_v20 = vld [vmem:[%s705_s0 + $0x40] ss:$8 sps:$4 sm:$0xff]   ;;  %v543_v21 = vld [vmem:[%s705_s0 + $0x54] ss:$8 sps:$4 sm:$0xff]   ;;  %v534_v23 = vld [vmem:[%s705_s0 + $0x24] ss:$8 sps:$4 sm:$0xff]  }
   0x9   :  { %310 = vmatprep.mubr.bf16.mxu1 %v542_v14  ;;  %v545_v24 = vld [vmem:[%s705_s0 + $0x50] ss:$8 sps:$4 sm:$0xff]   ;;  %v546_v25 = vld [vmem:[%s705_s0 + $0x64] ss:$8 sps:$4 sm:$0xff]   ;;  %v536_v26 = vld [vmem:[%s705_s0 + $0x20] ss:$8 sps:$4 sm:$0xff]  }
   0xa   :  { %v537_v27 = vld [vmem:[%s705_s0 + $0x34] ss:$8 sps:$4 sm:$0xff]   ;;  %v548_v28 = vld [vmem:[%s705_s0 + $0x60] ss:$8 sps:$4 sm:$0xff]   ;;  %v539_v30 = vld [vmem:[%s705_s0 + $0x30] ss:$8 sps:$4 sm:$0xff]  }
   0xb   :  { %437 = vmatpush3.bf16.msra.mxu0 %v517_v5  ;;  %506 = vmatpush3.bf16.msra.mxu1 %v517_v5  ;;  %v549_v29 = vld [vmem:[%s705_s0 + $0x74] ss:$8 sps:$4 sm:$0xff]   ;;  %v551_v31 = vld [vmem:[%s705_s0 + $0x70] ss:$8 sps:$4 sm:$0xff]   ;;  %v671_v34 = vld [vmem:[%s706_s2] ss:$0 sm:$0xff] }
   0xc   :  { %438 = vmatprep.subr.bf16.mxu0 %v518_v6  ;;  %499 = vmatprep.subr.bf16.mxu1 %v518_v6 }
   0xf   :  { %439 = vmatpush3.bf16.msra.mxu0 %v519_v7  ;;  %507 = vmatpush3.bf16.msra.mxu1 %v519_v7 }
  0x10   :  { %440 = vmatprep.subr.bf16.mxu0 %v520_v8  ;;  %500 = vmatprep.subr.bf16.mxu1 %v520_v8 }
  0x13   :  { %441 = vmatpush3.bf16.msra.mxu0 %v521_v9  ;;  %508 = vmatpush3.bf16.msra.mxu1 %v521_v9 }
  0x14   :  { %442 = vmatprep.subr.bf16.mxu0 %v522_v10  ;;  %501 = vmatprep.subr.bf16.mxu1 %v522_v10 }
  0x17   :  { %443 = vmatpush3.bf16.msra.mxu0 %v523_v12  ;;  %509 = vmatpush3.bf16.msra.mxu1 %v523_v12 }
  0x18   :  { %444 = vmatprep.subr.bf16.mxu0 %v524_v13  ;;  %502 = vmatprep.subr.bf16.mxu1 %v524_v13 }
  0x1b   :  { %445 = vmatpush3.bf16.msra.mxu0 %v525_v15  ;;  %510 = vmatpush3.bf16.msra.mxu1 %v525_v15 }
  0x1c   :  { %446 = vmatprep.subr.bf16.mxu0 %v526_v16  ;;  %503 = vmatprep.subr.bf16.mxu1 %v526_v16 }
  0x1f   :  { %447 = vmatpush3.bf16.msra.mxu0 %v527_v17  ;;  %511 = vmatpush3.bf16.msra.mxu1 %v527_v17 }
  0x22   :  { %279 = vmatmul.mubr.bf16.vlgmr.msra.gmra.mrb[0].mxu0 %v528_v18  ;;  %311 = vmatmul.mubr.bf16.vlgmr.msra.gmra.mrb[0].mxu1 %v540_v20 }
  0x23   :  { %286 = vmatprep.mubr.bf16.mxu0 %v531_v19  ;;  %318 = vmatprep.mubr.bf16.mxu1 %v543_v21 }
  0x2a   :  { %287 = vmatmul.mubr.bf16.gmra.mrb[4].mxu0 %v533_v22  ;;  %319 = vmatmul.mubr.bf16.gmra.mrb[4].mxu1 %v545_v24 }
  0x2b   :  { %294 = vmatprep.mubr.bf16.mxu0 %v534_v23  ;;  %326 = vmatprep.mubr.bf16.mxu1 %v546_v25 }
  0x32   :  { %295 = vmatmul.mubr.bf16.gmra.mrb[8].mxu0 %v536_v26  ;;  %327 = vmatmul.mubr.bf16.gmra.mrb[8].mxu1 %v548_v28 }
  0x33   :  { %302 = vmatprep.mubr.bf16.mxu0 %v537_v27  ;;  %334 = vmatprep.mubr.bf16.mxu1 %v549_v29 }
  0x3a   :  { %303 = vmatmul.mubr.bf16.gmra.mrb[12].mxu0 %v539_v30  ;;  %335 = vmatmul.mubr.bf16.gmra.mrb[12].mxu1 %v551_v31 }
  0xf5   :  { %v448_v32 = vpop.f32.mrb[0].mxu0  ;;  %v472_v35 = vpop.f32.mrb[0].mxu1 }
  0xf6   :  { %v449_v33 = vpop.f32.mrb[1].mxu0  ;;  %v473_v38 = vpop.f32.mrb[1].mxu1 }
  0xf7   :  { %v450_v36 = vadd.f32 %v449_v33, %v448_v32  ;;  %v451_v37 = vpop.f32.mrb[2].mxu0  ;;  %v673_v40 = vadd.f32 %v473_v38, %v472_v35  ;;  %v475_v41 = vpop.f32.mrb[2].mxu1 }
  0xf8   :  { %v452_v39 = vpop.f32.mrb[3].mxu0  ;;  %v476_v44 = vpop.f32.mrb[3].mxu1 }
  0xf9   :  { %v453_v42 = vadd.f32 %v452_v39, %v451_v37  ;;  %v281_v43 = vadd.f32 %v450_v36, %v671_v34  ;;  %v477_v45 = vadd.f32 %v476_v44, %v475_v41  ;;  %v313_v32 = vadd.f32 %v673_v40, %v671_v34 }
  0xfb   :  { %v343_v46 = vmax.f32 %v281_v43, 0.0  ;;  %v284_v47 = vadd.f32 %v453_v42, %v671_v34  ;;  %v351_v35 = vmax.f32 %v313_v32, 0.0  ;;  %v316_v36 = vadd.f32 %v477_v45, %v671_v34 }
  0xfd   :  { %v454_v48 = vpop.f32.mrb[4].mxu0  ;;  %359 = vxpose.xlu0.b32.start [1/16] (narrow) %v343_v46, 32  ;;  %v478_v50 = vpop.f32.mrb[4].mxu1  ;;  %v344_v53 = vmax.f32 %v284_v47, 0.0  ;;  %v352_v38 = vmax.f32 %v316_v36, 0.0 }
  0xfe   :  { %v455_v49 = vpop.f32.mrb[5].mxu0  ;;  %v479_v54 = vpop.f32.mrb[5].mxu1 }
  0xff   :  { %v456_v51 = vadd.f32 %v455_v49, %v454_v48  ;;  %v457_v52 = vpop.f32.mrb[6].mxu0  ;;  %v480_v56 = vadd.f32 %v479_v54, %v478_v50  ;;  %v481_v57 = vpop.f32.mrb[6].mxu1 }
 0x100   :  { %v458_v55 = vpop.f32.mrb[7].mxu0  ;;  %v482_v60 = vpop.f32.mrb[7].mxu1 }
 0x101   :  { %v459_v58 = vadd.f32 %v458_v55, %v457_v52  ;;  %360 = vxpose.xlu0.b32.cont [2/16] (narrow) %v344_v53, 32  ;;  %v289_v59 = vadd.f32 %v456_v51, %v671_v34  ;;  %v483_v61 = vadd.f32 %v482_v60, %v481_v57  ;;  %v321_v37 = vadd.f32 %v480_v56, %v671_v34 }
 0x103   :  { %v345_v62 = vmax.f32 %v289_v59, 0.0  ;;  %v292_v63 = vadd.f32 %v459_v58, %v671_v34  ;;  %v353_v39 = vmax.f32 %v321_v37, 0.0  ;;  %v324_v41 = vadd.f32 %v483_v61, %v671_v34 }
 0x105   :  { %v460_v0 = vpop.f32.mrb[8].mxu0  ;;  %361 = vxpose.xlu0.b32.cont [3/16] (narrow) %v345_v62, 32  ;;  %v484_v2 = vpop.f32.mrb[8].mxu1  ;;  %v346_v5 = vmax.f32 %v292_v63, 0.0  ;;  %v354_v43 = vmax.f32 %v324_v41, 0.0 }
 0x106   :  { %v461_v1 = vpop.f32.mrb[9].mxu0  ;;  %v485_v6 = vpop.f32.mrb[9].mxu1 }
 0x107   :  { %v462_v3 = vadd.f32 %v461_v1, %v460_v0  ;;  %v463_v4 = vpop.f32.mrb[10].mxu0  ;;  %v486_v8 = vadd.f32 %v485_v6, %v484_v2  ;;  %v487_v9 = vpop.f32.mrb[10].mxu1 }
 0x108   :  { %v464_v7 = vpop.f32.mrb[11].mxu0  ;;  %v488_v12 = vpop.f32.mrb[11].mxu1 }
 0x109   :  { %v465_v10 = vadd.f32 %v464_v7, %v463_v4  ;;  %362 = vxpose.xlu0.b32.cont [4/16] (narrow) %v346_v5, 32  ;;  %v297_v11 = vadd.f32 %v462_v3, %v671_v34  ;;  %v489_v13 = vadd.f32 %v488_v12, %v487_v9  ;;  %v329_v42 = vadd.f32 %v486_v8, %v671_v34 }
 0x10b   :  { %v347_v14 = vmax.f32 %v297_v11, 0.0  ;;  %v300_v15 = vadd.f32 %v465_v10, %v671_v34  ;;  %v355_v44 = vmax.f32 %v329_v42, 0.0  ;;  %v332_v40 = vadd.f32 %v489_v13, %v671_v34 }
 0x10d   :  { %v466_v16 = vpop.f32.mrb[12].mxu0  ;;  %363 = vxpose.xlu0.b32.cont [5/16] (narrow) %v347_v14, 32  ;;  %v490_v18 = vpop.f32.mrb[12].mxu1  ;;  %v348_v21 = vmax.f32 %v300_v15, 0.0  ;;  %v356_v45 = vmax.f32 %v332_v40, 0.0 }
 0x10e   :  { %v467_v17 = vpop.f32.mrb[13].mxu0  ;;  %v491_v22 = vpop.f32.mrb[13].mxu1 }
 0x10f   :  { %v468_v19 = vadd.f32 %v467_v17, %v466_v16  ;;  %v469_v20 = vpop.f32.mrb[14].mxu0  ;;  %v492_v24 = vadd.f32 %v491_v22, %v490_v18  ;;  %v493_v25 = vpop.f32.mrb[14].mxu1 }
 0x110   :  { %v470_v23 = vpop.f32.mrb[15].mxu0  ;;  %v494_v28 = vpop.f32.mrb[15].mxu1 }
 0x111   :  { %v471_v26 = vadd.f32 %v470_v23, %v469_v20  ;;  %364 = vxpose.xlu0.b32.cont [6/16] (narrow) %v348_v21, 32  ;;  %v305_v27 = vadd.f32 %v468_v19, %v671_v34  ;;  %v495_v29 = vadd.f32 %v494_v28, %v493_v25  ;;  %v337_v46 = vadd.f32 %v492_v24, %v671_v34 }
 0x113   :  { %v349_v30 = vmax.f32 %v305_v27, 0.0  ;;  %v308_v31 = vadd.f32 %v471_v26, %v671_v34  ;;  %v357_v47 = vmax.f32 %v337_v46, 0.0  ;;  %v340_v48 = vadd.f32 %v495_v29, %v671_v34 }
 0x115   :  { %365 = vxpose.xlu0.b32.cont [7/16] (narrow) %v349_v30, 32  ;;  %v350_v33 = vmax.f32 %v308_v31, 0.0  ;;  %v358_v49 = vmax.f32 %v340_v48, 0.0 }
 0x119   :  { %366 = vxpose.xlu0.b32.cont [8/16] (narrow) %v350_v33, 32 }
 0x11d   :  { %367 = vxpose.xlu0.b32.cont [9/16] (narrow) %v351_v35, 32 }
 0x121   :  { %368 = vxpose.xlu0.b32.cont [10/16] (narrow) %v352_v38, 32 }
 0x125   :  { %369 = vxpose.xlu0.b32.cont [11/16] (narrow) %v353_v39, 32 }
 0x129   :  { %370 = vxpose.xlu0.b32.cont [12/16] (narrow) %v354_v43, 32 }
 0x12d   :  { %371 = vxpose.xlu0.b32.cont [13/16] (narrow) %v355_v44, 32 }
 0x131   :  { %372 = vxpose.xlu0.b32.cont [14/16] (narrow) %v356_v45, 32 }
 0x135   :  { %373 = vxpose.xlu0.b32.cont [15/16] (narrow) %v357_v47, 32 }
 0x139   :  { %374 = vxpose.xlu0.b32.end [16/16] (narrow) %v358_v49, 32 }
 0x17d   :  { %v375_v50 = vpop.trf.xlu0 }
 0x17e   :  { %391 = vst [vmem:[%s707_s3] sm:$0xff] %v375_v50 }
 0x181   :  { %v376_v51 = vpop.trf.xlu0 }
 0x182   :  { %392 = vst [vmem:[%s707_s3 + $0x8] sm:$0xff] %v376_v51 }
 0x185   :  { %v377_v52 = vpop.trf.xlu0 }
 0x186   :  { %393 = vst [vmem:[%s707_s3 + $0x10] sm:$0xff] %v377_v52 }
 0x189   :  { %v378_v53 = vpop.trf.xlu0 }
 0x18a   :  { %394 = vst [vmem:[%s707_s3 + $0x18] sm:$0xff] %v378_v53 }

// kernel: cnn_encoder_forward.4
= control target key start
LH: loop header
LB: loop body
LE: loop exit
PB: predicated region body
PF: predicated region fallthrough
CT: control target
= control target key end

     0   :  { %s1254_s1 = inlined_call_operand.vmem [shape: bf16[512,64], index: 1, kind: input, shape index: {}]   ;;  %s1255_s0 = inlined_call_operand.vmem [shape: bf16[128,512], index: 0, kind: input, shape index: {}]   ;;  %s1256_s2 = inlined_call_operand.vmem [shape: f32[1,64], index: 2, kind: input, shape index: {}]   ;;  %s1257_s3 = inlined_call_operand.vmem [shape: f32[64,128], index: 3, kind: output, shape index: {}]  }
   0x1   :  { %v917_v0 = vld [vmem:[%s1254_s1 + $0x40] sm:$0xff]   ;;  %v921_v4 = vld [vmem:[%s1254_s1 + $0x48] sm:$0xff]   ;;  %v925_v8 = vld [vmem:[%s1254_s1 + $0x50] sm:$0xff]  }
   0x2   :  { %v918_v1 = vld [vmem:[%s1254_s1 + $0xc0] sm:$0xff]   ;;  %789 = vmatprep.subr.bf16.mxu0 %v917_v0  ;;  %v922_v5 = vld [vmem:[%s1254_s1 + $0xc8] sm:$0xff]   ;;  %v926_v9 = vld [vmem:[%s1254_s1 + $0xd0] sm:$0xff]  }
   0x3   :  { %v919_v2 = vld [vmem:[%s1254_s1] sm:$0xff]   ;;  %853 = vmatprep.subr.bf16.mxu1 %v918_v1  ;;  %v923_v6 = vld [vmem:[%s1254_s1 + $0x8] sm:$0xff]   ;;  %v927_v10 = vld [vmem:[%s1254_s1 + $0x10] sm:$0xff]  }
   0x4   :  { %v920_v3 = vld [vmem:[%s1254_s1 + $0x80] sm:$0xff]   ;;  %790 = vmatpush3.bf16.msra.mxu0 %v919_v2  ;;  %v924_v7 = vld [vmem:[%s1254_s1 + $0x88] sm:$0xff]   ;;  %v928_v11 = vld [vmem:[%s1254_s1 + $0x90] sm:$0xff]  }
   0x5   :  { %854 = vmatpush3.bf16.msra.mxu1 %v920_v3  ;;  %791 = vmatprep.subr.bf16.mxu0 %v921_v4  ;;  %v929_v12 = vld [vmem:[%s1254_s1 + $0x58] sm:$0xff]   ;;  %v933_v16 = vld [vmem:[%s1254_s1 + $0x60] sm:$0xff]   ;;  %v937_v20 = vld [vmem:[%s1254_s1 + $0x68] sm:$0xff]  }
   0x6   :  { %855 = vmatprep.subr.bf16.mxu1 %v922_v5  ;;  %v930_v13 = vld [vmem:[%s1254_s1 + $0xd8] sm:$0xff]   ;;  %v934_v17 = vld [vmem:[%s1254_s1 + $0xe0] sm:$0xff]   ;;  %v938_v21 = vld [vmem:[%s1254_s1 + $0xe8] sm:$0xff]  }
   0x7   :  { %v931_v14 = vld [vmem:[%s1254_s1 + $0x18] sm:$0xff]   ;;  %v935_v18 = vld [vmem:[%s1254_s1 + $0x20] sm:$0xff]   ;;  %v939_v22 = vld [vmem:[%s1254_s1 + $0x28] sm:$0xff]  }
   0x8   :  { %792 = vmatpush3.bf16.msra.mxu0 %v923_v6  ;;  %v932_v15 = vld [vmem:[%s1254_s1 + $0x98] sm:$0xff]   ;;  %v936_v19 = vld [vmem:[%s1254_s1 + $0xa0] sm:$0xff]   ;;  %v940_v23 = vld [vmem:[%s1254_s1 + $0xa8] sm:$0xff]  }
   0x9   :  { %856 = vmatpush3.bf16.msra.mxu1 %v924_v7  ;;  %793 = vmatprep.subr.bf16.mxu0 %v925_v8  ;;  %v941_v24 = vld [vmem:[%s1254_s1 + $0x70] sm:$0xff]   ;;  %v945_v28 = vld [vmem:[%s1254_s1 + $0x78] sm:$0xff]   ;;  %v1212_v3 = vld [vmem:[%s1256_s2] ss:$0 sm:$0xff] }
   0xa   :  { %857 = vmatprep.subr.bf16.mxu1 %v926_v9  ;;  %v942_v25 = vld [vmem:[%s1254_s1 + $0xf0] sm:$0xff]   ;;  %v946_v29 = vld [vmem:[%s1254_s1 + $0xf8] sm:$0xff]  }
   0xb   :  { %v943_v26 = vld [vmem:[%s1254_s1 + $0x30] sm:$0xff]   ;;  %v947_v30 = vld [vmem:[%s1254_s1 + $0x38] sm:$0xff]  }
   0xc   :  { %794 = vmatpush3.bf16.msra.mxu0 %v927_v10  ;;  %v944_v27 = vld [vmem:[%s1254_s1 + $0xb0] sm:$0xff]   ;;  %v948_v31 = vld [vmem:[%s1254_s1 + $0xb8] sm:$0xff]  }
   0xd   :  { %858 = vmatpush3.bf16.msra.mxu1 %v928_v11  ;;  %795 = vmatprep.subr.bf16.mxu0 %v929_v12  ;;  %v949_v32 = vld [vmem:[%s1255_s0] ss:$16 sps:$4 sm:$0xff]   ;;  %v951_v33 = vld [vmem:[%s1255_s0 + $0x4] ss:$16 sps:$4 sm:$0xff]   ;;  %v952_v34 = vld [vmem:[%s1255_s0 + $0x8] ss:$16 sps:$4 sm:$0xff]  }
   0xe   :  { %859 = vmatprep.subr.bf16.mxu1 %v930_v13  ;;  %v954_v35 = vld [vmem:[%s1255_s0 + $0xc] ss:$16 sps:$4 sm:$0xff]   ;;  %502 = vmatprep.mubr.bf16.mxu0 %v951_v33  ;;  %v955_v36 = vld [vmem:[%s1255_s0 + $0x24] ss:$16 sps:$4 sm:$0xff]   ;;  %v959_v38 = vld [vmem:[%s1255_s0 + $0x20] ss:$16 sps:$4 sm:$0xff]  }
   0xf   :  { %599 = vmatprep.mubr.bf16.mxu1 %v954_v35  ;;  %v957_v37 = vld [vmem:[%s1255_s0 + $0x2c] ss:$16 sps:$4 sm:$0xff]   ;;  %v960_v39 = vld [vmem:[%s1255_s0 + $0x28] ss:$16 sps:$4 sm:$0xff]   ;;  %v961_v40 = vld [vmem:[%s1255_s0 + $0x44] ss:$16 sps:$4 sm:$0xff]  }
  0x10   :  { %796 = vmatpush3.bf16.msra.mxu0 %v931_v14  ;;  %v963_v41 = vld [vmem:[%s1255_s0 + $0x4c] ss:$16 sps:$4 sm:$0xff]   ;;  %v965_v42 = vld [vmem:[%s1255_s0 + $0x40] ss:$16 sps:$4 sm:$0xff]   ;;  %v966_v43 = vld [vmem:[%s1255_s0 + $0x48] ss:$16 sps:$4 sm:$0xff]  }
  0x11   :  { %860 = vmatpush3.bf16.msra.mxu1 %v932_v15  ;;  %797 = vmatprep.subr.bf16.mxu0 %v933_v16  ;;  %v967_v44 = vld [vmem:[%s1255_s0 + $0x64] ss:$16 sps:$4 sm:$0xff]   ;;  %v969_v45 = vld [vmem:[%s1255_s0 + $0x6c] ss:$16 sps:$4 sm:$0xff]   ;;  %v971_v46 = vld [vmem:[%s1255_s0 + $0x60] ss:$16 sps:$4 sm:$0xff]  }
  0x12   :  { %861 = vmatprep.subr.bf16.mxu1 %v934_v17  ;;  %v972_v47 = vld [vmem:[%s1255_s0 + $0x68] ss:$16 sps:$4 sm:$0xff]   ;;  %v973_v48 = vld [vmem:[%s1255_s0 + $0x84] ss:$16 sps:$4 sm:$0xff]   ;;  %v975_v49 = vld [vmem:[%s1255_s0 + $0x8c] ss:$16 sps:$4 sm:$0xff]  }
  0x13   :  { %v977_v50 = vld [vmem:[%s1255_s0 + $0x80] ss:$16 sps:$4 sm:$0xff]   ;;  %v978_v51 = vld [vmem:[%s1255_s0 + $0x88] ss:$16 sps:$4 sm:$0xff]   ;;  %v979_v52 = vld [vmem:[%s1255_s0 + $0xa4] ss:$16 sps:$4 sm:$0xff]  }
  0x14   :  { %798 = vmatpush3.bf16.msra.mxu0 %v935_v18  ;;  %v981_v53 = vld [vmem:[%s1255_s0 + $0xac] ss:$16 sps:$4 sm:$0xff]   ;;  %v983_v54 = vld [vmem:[%s1255_s0 + $0xa0] ss:$16 sps:$4 sm:$0xff]   ;;  %v984_v55 = vld [vmem:[%s1255_s0 + $0xa8] ss:$16 sps:$4 sm:$0xff]  }
  0x15   :  { %862 = vmatpush3.bf16.msra.mxu1 %v936_v19  ;;  %799 = vmatprep.subr.bf16.mxu0 %v937_v20  ;;  %v985_v56 = vld [vmem:[%s1255_s0 + $0xc4] ss:$16 sps:$4 sm:$0xff]   ;;  %v987_v57 = vld [vmem:[%s1255_s0 + $0xcc] ss:$16 sps:$4 sm:$0xff]   ;;  %v989_v58 = vld [vmem:[%s1255_s0 + $0xc0] ss:$16 sps:$4 sm:$0xff]  }
  0x16   :  { %863 = vmatprep.subr.bf16.mxu1 %v938_v21  ;;  %v990_v59 = vld [vmem:[%s1255_s0 + $0xc8] ss:$16 sps:$4 sm:$0xff]   ;;  %v991_v60 = vld [vmem:[%s1255_s0 + $0xe4] ss:$16 sps:$4 sm:$0xff]   ;;  %v993_v61 = vld [vmem:[%s1255_s0 + $0xec] ss:$16 sps:$4 sm:$0xff]  }
  0x17   :  { %v995_v62 = vld [vmem:[%s1255_s0 + $0xe0] ss:$16 sps:$4 sm:$0xff]   ;;  %v996_v63 = vld [vmem:[%s1255_s0 + $0xe8] ss:$16 sps:$4 sm:$0xff]  }
  0x18   :  { %800 = vmatpush3.bf16.msra.mxu0 %v939_v22 }
  0x19   :  { %864 = vmatpush3.bf16.msra.mxu1 %v940_v23  ;;  %801 = vmatprep.subr.bf16.mxu0 %v941_v24 }
  0x1a   :  { %865 = vmatprep.subr.bf16.mxu1 %v942_v25 }
  0x1c   :  { %802 = vmatpush3.bf16.msra.mxu0 %v943_v26 }
  0x1d   :  { %866 = vmatpush3.bf16.msra.mxu1 %v944_v27  ;;  %803 = vmatprep.subr.bf16.mxu0 %v945_v28 }
  0x1e   :  { %867 = vmatprep.subr.bf16.mxu1 %v946_v29 }
  0x20   :  { %804 = vmatpush3.bf16.msra.mxu0 %v947_v30 }
  0x21   :  { %868 = vmatpush3.bf16.msra.mxu1 %v948_v31 }
  0x23   :  { %503 = vmatmul.mubr.bf16.vlgmr.msra.gmra.mrb[0].mxu0 %v949_v32 }
  0x24   :  { %600 = vmatmul.mubr.bf16.vlgmr.msra.gmra.mrb[0].mxu1 %v952_v34  ;;  %510 = vmatprep.mubr.bf16.mxu0 %v955_v36 }
  0x25   :  { %607 = vmatprep.mubr.bf16.mxu1 %v957_v37 }
  0x2b   :  { %511 = vmatmul.mubr.bf16.gmra.mrb[4].mxu0 %v959_v38 }
  0x2c   :  { %608 = vmatmul.mubr.bf16.gmra.mrb[4].mxu1 %v960_v39  ;;  %518 = vmatprep.mubr.bf16.mxu0 %v961_v40 }
  0x2d   :  { %615 = vmatprep.mubr.bf16.mxu1 %v963_v41 }
  0x33   :  { %519 = vmatmul.mubr.bf16.gmra.mrb[8].mxu0 %v965_v42 }
  0x34   :  { %616 = vmatmul.mubr.bf16.gmra.mrb[8].mxu1 %v966_v43  ;;  %526 = vmatprep.mubr.bf16.mxu0 %v967_v44 }
  0x35   :  { %623 = vmatprep.mubr.bf16.mxu1 %v969_v45 }
  0x3b   :  { %527 = vmatmul.mubr.bf16.gmra.mrb[12].mxu0 %v971_v46 }
  0x3c   :  { %624 = vmatmul.mubr.bf16.gmra.mrb[12].mxu1 %v972_v47  ;;  %534 = vmatprep.mubr.bf16.mxu0 %v973_v48 }
  0x3d   :  { %631 = vmatprep.mubr.bf16.mxu1 %v975_v49 }
  0x43   :  { %535 = vmatmul.mubr.bf16.gmra.mrb[16].mxu0 %v977_v50 }
  0x44   :  { %632 = vmatmul.mubr.bf16.gmra.mrb[16].mxu1 %v978_v51  ;;  %542 = vmatprep.mubr.bf16.mxu0 %v979_v52 }
  0x45   :  { %639 = vmatprep.mubr.bf16.mxu1 %v981_v53 }
  0x4b   :  { %543 = vmatmul.mubr.bf16.gmra.mrb[20].mxu0 %v983_v54 }
  0x4c   :  { %640 = vmatmul.mubr.bf16.gmra.mrb[20].mxu1 %v984_v55  ;;  %550 = vmatprep.mubr.bf16.mxu0 %v985_v56 }
  0x4d   :  { %647 = vmatprep.mubr.bf16.mxu1 %v987_v57 }
  0x53   :  { %551 = vmatmul.mubr.bf16.gmra.mrb[24].mxu0 %v989_v58 }
  0x54   :  { %648 = vmatmul.mubr.bf16.gmra.mrb[24].mxu1 %v990_v59  ;;  %558 = vmatprep.mubr.bf16.mxu0 %v991_v60 }
  0x55   :  { %655 = vmatprep.mubr.bf16.mxu1 %v993_v61 }
  0x5b   :  { %559 = vmatmul.mubr.bf16.gmra.mrb[28].mxu0 %v995_v62 }
  0x5c   :  { %656 = vmatmul.mubr.bf16.gmra.mrb[28].mxu1 %v996_v63 }
  0xf6   :  { %v805_v0 = vpop.f32.mrb[0].mxu0 }
  0xf7   :  { %v869_v1 = vpop.f32.mrb[0].mxu1  ;;  %v806_v2 = vpop.f32.mrb[1].mxu0 }
  0xf8   :  { %v807_v4 = vadd.f32 %v806_v2, %v805_v0  ;;  %v870_v5 = vpop.f32.mrb[1].mxu1  ;;  %v808_v6 = vpop.f32.mrb[2].mxu0 }
  0xf9   :  { %v871_v7 = vadd.f32 %v870_v5, %v869_v1  ;;  %v872_v8 = vpop.f32.mrb[2].mxu1  ;;  %v809_v9 = vpop.f32.mrb[3].mxu0 }
  0xfa   :  { %v810_v10 = vadd.f32 %v809_v9, %v808_v6  ;;  %v873_v11 = vpop.f32.mrb[3].mxu1  ;;  %v505_v12 = vadd.f32 %v807_v4, %v1212_v3 }
  0xfb   :  { %v874_v13 = vadd.f32 %v873_v11, %v872_v8 }
  0xfc   :  { %v508_v14 = vadd.f32 %v810_v10, %v1212_v3  ;;  %v602_v15 = vadd.f32 %v871_v7, %v505_v12 }
  0xfe   :  { %v811_v16 = vpop.f32.mrb[4].mxu0  ;;  %v664_v17 = vmax.f32 %v602_v15, 0.0  ;;  %v605_v18 = vadd.f32 %v874_v13, %v508_v14 }
  0xff   :  { %v875_v19 = vpop.f32.mrb[4].mxu1  ;;  %v812_v20 = vpop.f32.mrb[5].mxu0 }
 0x100   :  { %v813_v21 = vadd.f32 %v812_v20, %v811_v16  ;;  %v876_v22 = vpop.f32.mrb[5].mxu1  ;;  %v814_v23 = vpop.f32.mrb[6].mxu0  ;;  %680 = vxpose.xlu0.b32.start [1/16] (narrow) %v664_v17, 64  ;;  %v665_v30 = vmax.f32 %v605_v18, 0.0 }
 0x101   :  { %v877_v24 = vadd.f32 %v876_v22, %v875_v19  ;;  %v878_v25 = vpop.f32.mrb[6].mxu1  ;;  %v815_v26 = vpop.f32.mrb[7].mxu0 }
 0x102   :  { %v513_v27 = vadd.f32 %v813_v21, %v1212_v3  ;;  %v816_v28 = vadd.f32 %v815_v26, %v814_v23  ;;  %v879_v29 = vpop.f32.mrb[7].mxu1 }
 0x103   :  { %v880_v31 = vadd.f32 %v879_v29, %v878_v25 }
 0x104   :  { %v516_v32 = vadd.f32 %v816_v28, %v1212_v3  ;;  %681 = vxpose.xlu0.b32.cont [2/16] (narrow) %v665_v30, 64  ;;  %v610_v33 = vadd.f32 %v877_v24, %v513_v27 }
 0x106   :  { %v817_v34 = vpop.f32.mrb[8].mxu0  ;;  %v666_v35 = vmax.f32 %v610_v33, 0.0  ;;  %v613_v36 = vadd.f32 %v880_v31, %v516_v32 }
 0x107   :  { %v881_v37 = vpop.f32.mrb[8].mxu1  ;;  %v818_v38 = vpop.f32.mrb[9].mxu0 }
 0x108   :  { %v819_v39 = vadd.f32 %v818_v38, %v817_v34  ;;  %v882_v40 = vpop.f32.mrb[9].mxu1  ;;  %v820_v41 = vpop.f32.mrb[10].mxu0  ;;  %682 = vxpose.xlu0.b32.cont [3/16] (narrow) %v666_v35, 64  ;;  %v667_v48 = vmax.f32 %v613_v36, 0.0 }
 0x109   :  { %v883_v42 = vadd.f32 %v882_v40, %v881_v37  ;;  %v884_v43 = vpop.f32.mrb[10].mxu1  ;;  %v821_v44 = vpop.f32.mrb[11].mxu0 }
 0x10a   :  { %v521_v45 = vadd.f32 %v819_v39, %v1212_v3  ;;  %v822_v46 = vadd.f32 %v821_v44, %v820_v41  ;;  %v885_v47 = vpop.f32.mrb[11].mxu1 }
 0x10b   :  { %v886_v49 = vadd.f32 %v885_v47, %v884_v43 }
 0x10c   :  { %v524_v50 = vadd.f32 %v822_v46, %v1212_v3  ;;  %683 = vxpose.xlu0.b32.cont [4/16] (narrow) %v667_v48, 64  ;;  %v618_v51 = vadd.f32 %v883_v42, %v521_v45 }
 0x10e   :  { %v823_v52 = vpop.f32.mrb[12].mxu0  ;;  %v668_v53 = vmax.f32 %v618_v51, 0.0  ;;  %v621_v54 = vadd.f32 %v886_v49, %v524_v50 }
 0x10f   :  { %v887_v55 = vpop.f32.mrb[12].mxu1  ;;  %v824_v56 = vpop.f32.mrb[13].mxu0 }
 0x110   :  { %v825_v57 = vadd.f32 %v824_v56, %v823_v52  ;;  %v888_v58 = vpop.f32.mrb[13].mxu1  ;;  %v826_v59 = vpop.f32.mrb[14].mxu0  ;;  %684 = vxpose.xlu0.b32.cont [5/16] (narrow) %v668_v53, 64  ;;  %v669_v2 = vmax.f32 %v621_v54, 0.0 }
 0x111   :  { %v889_v60 = vadd.f32 %v888_v58, %v887_v55  ;;  %v890_v61 = vpop.f32.mrb[14].mxu1  ;;  %v827_v62 = vpop.f32.mrb[15].mxu0 }
 0x112   :  { %v529_v63 = vadd.f32 %v825_v57, %v1212_v3  ;;  %v828_v0 = vadd.f32 %v827_v62, %v826_v59  ;;  %v891_v1 = vpop.f32.mrb[15].mxu1 }
 0x113   :  { %v892_v4 = vadd.f32 %v891_v1, %v890_v61 }
 0x114   :  { %v532_v5 = vadd.f32 %v828_v0, %v1212_v3  ;;  %685 = vxpose.xlu0.b32.cont [6/16] (narrow) %v669_v2, 64  ;;  %v626_v6 = vadd.f32 %v889_v60, %v529_v63 }
 0x116   :  { %v829_v7 = vpop.f32.mrb[16].mxu0  ;;  %v670_v8 = vmax.f32 %v626_v6, 0.0  ;;  %v629_v9 = vadd.f32 %v892_v4, %v532_v5 }
 0x117   :  { %v893_v10 = vpop.f32.mrb[16].mxu1  ;;  %v830_v11 = vpop.f32.mrb[17].mxu0 }
 0x118   :  { %v831_v12 = vadd.f32 %v830_v11, %v829_v7  ;;  %v894_v13 = vpop.f32.mrb[17].mxu1  ;;  %v832_v14 = vpop.f32.mrb[18].mxu0  ;;  %686 = vxpose.xlu0.b32.cont [7/16] (narrow) %v670_v8, 64  ;;  %v671_v21 = vmax.f32 %v629_v9, 0.0 }
 0x119   :  { %v895_v15 = vadd.f32 %v894_v13, %v893_v10  ;;  %v896_v16 = vpop.f32.mrb[18].mxu1  ;;  %v833_v17 = vpop.f32.mrb[19].mxu0 }
 0x11a   :  { %v537_v18 = vadd.f32 %v831_v12, %v1212_v3  ;;  %v834_v19 = vadd.f32 %v833_v17, %v832_v14  ;;  %v897_v20 = vpop.f32.mrb[19].mxu1 }
 0x11b   :  { %v898_v22 = vadd.f32 %v897_v20, %v896_v16 }
 0x11c   :  { %v540_v23 = vadd.f32 %v834_v19, %v1212_v3  ;;  %687 = vxpose.xlu0.b32.cont [8/16] (narrow) %v671_v21, 64  ;;  %v634_v24 = vadd.f32 %v895_v15, %v537_v18 }
 0x11e   :  { %v835_v25 = vpop.f32.mrb[20].mxu0  ;;  %v672_v26 = vmax.f32 %v634_v24, 0.0  ;;  %v637_v27 = vadd.f32 %v898_v22, %v540_v23 }
 0x11f   :  { %v899_v28 = vpop.f32.mrb[20].mxu1  ;;  %v836_v29 = vpop.f32.mrb[21].mxu0 }
 0x120   :  { %v837_v30 = vadd.f32 %v836_v29, %v835_v25  ;;  %v900_v31 = vpop.f32.mrb[21].mxu1  ;;  %v838_v32 = vpop.f32.mrb[22].mxu0  ;;  %688 = vxpose.xlu0.b32.cont [9/16] (narrow) %v672_v26, 64  ;;  %v673_v39 = vmax.f32 %v637_v27, 0.0 }
 0x121   :  { %v901_v33 = vadd.f32 %v900_v31, %v899_v28  ;;  %v902_v34 = vpop.f32.mrb[22].mxu1  ;;  %v839_v35 = vpop.f32.mrb[23].mxu0 }
 0x122   :  { %v545_v36 = vadd.f32 %v837_v30, %v1212_v3  ;;  %v840_v37 = vadd.f32 %v839_v35, %v838_v32  ;;  %v903_v38 = vpop.f32.mrb[23].mxu1 }
 0x123   :  { %v904_v40 = vadd.f32 %v903_v38, %v902_v34 }
 0x124   :  { %v548_v41 = vadd.f32 %v840_v37, %v1212_v3  ;;  %689 = vxpose.xlu0.b32.cont [10/16] (narrow) %v673_v39, 64  ;;  %v642_v42 = vadd.f32 %v901_v33, %v545_v36 }
 0x126   :  { %v841_v43 = vpop.f32.mrb[24].mxu0  ;;  %v674_v44 = vmax.f32 %v642_v42, 0.0  ;;  %v645_v45 = vadd.f32 %v904_v40, %v548_v41 }
 0x127   :  { %v905_v46 = vpop.f32.mrb[24].mxu1  ;;  %v842_v47 = vpop.f32.mrb[25].mxu0 }
 0x128   :  { %v843_v48 = vadd.f32 %v842_v47, %v841_v43  ;;  %v906_v49 = vpop.f32.mrb[25].mxu1  ;;  %v844_v50 = vpop.f32.mrb[26].mxu0  ;;  %690 = vxpose.xlu0.b32.cont [11/16] (narrow) %v674_v44, 64  ;;  %v675_v57 = vmax.f32 %v645_v45, 0.0 }
 0x129   :  { %v907_v51 = vadd.f32 %v906_v49, %v905_v46  ;;  %v908_v52 = vpop.f32.mrb[26].mxu1  ;;  %v845_v53 = vpop.f32.mrb[27].mxu0 }
 0x12a   :  { %v553_v54 = vadd.f32 %v843_v48, %v1212_v3  ;;  %v846_v55 = vadd.f32 %v845_v53, %v844_v50  ;;  %v909_v56 = vpop.f32.mrb[27].mxu1 }
 0x12b   :  { %v910_v58 = vadd.f32 %v909_v56, %v908_v52 }
 0x12c   :  { %v556_v59 = vadd.f32 %v846_v55, %v1212_v3  ;;  %691 = vxpose.xlu0.b32.cont [12/16] (narrow) %v675_v57, 64  ;;  %v650_v60 = vadd.f32 %v907_v51, %v553_v54 }
 0x12e   :  { %v847_v61 = vpop.f32.mrb[28].mxu0  ;;  %v676_v62 = vmax.f32 %v650_v60, 0.0  ;;  %v653_v63 = vadd.f32 %v910_v58, %v556_v59 }
 0x12f   :  { %v911_v0 = vpop.f32.mrb[28].mxu1  ;;  %v848_v1 = vpop.f32.mrb[29].mxu0 }
 0x130   :  { %v849_v2 = vadd.f32 %v848_v1, %v847_v61  ;;  %v912_v4 = vpop.f32.mrb[29].mxu1  ;;  %v850_v5 = vpop.f32.mrb[30].mxu0  ;;  %692 = vxpose.xlu0.b32.cont [13/16] (narrow) %v676_v62, 64  ;;  %v677_v12 = vmax.f32 %v653_v63, 0.0 }
 0x131   :  { %v913_v6 = vadd.f32 %v912_v4, %v911_v0  ;;  %v914_v7 = vpop.f32.mrb[30].mxu1  ;;  %v851_v8 = vpop.f32.mrb[31].mxu0 }
 0x132   :  { %v561_v9 = vadd.f32 %v849_v2, %v1212_v3  ;;  %v852_v10 = vadd.f32 %v851_v8, %v850_v5  ;;  %v915_v11 = vpop.f32.mrb[31].mxu1 }
 0x133   :  { %v916_v13 = vadd.f32 %v915_v11, %v914_v7 }
 0x134   :  { %v564_v14 = vadd.f32 %v852_v10, %v1212_v3  ;;  %693 = vxpose.xlu0.b32.cont [14/16] (narrow) %v677_v12, 64  ;;  %v658_v15 = vadd.f32 %v913_v6, %v561_v9 }
 0x136   :  { %v678_v16 = vmax.f32 %v658_v15, 0.0  ;;  %v661_v17 = vadd.f32 %v916_v13, %v564_v14 }
 0x138   :  { %694 = vxpose.xlu0.b32.cont [15/16] (narrow) %v678_v16, 64  ;;  %v679_v18 = vmax.f32 %v661_v17, 0.0 }
 0x13c   :  { %695 = vxpose.xlu0.b32.end [16/16] (narrow) %v679_v18, 64 }
 0x180   :  { %v696_v19 = vpop.trf.xlu0 }
 0x181   :  { %712 = vst [vmem:[%s1257_s3] sm:$0xff] %v696_v19 }
 0x184   :  { %v697_v20 = vpop.trf.xlu0 }
 0x185   :  { %713 = vst [vmem:[%s1257_s3 + $0x8] sm:$0xff] %v697_v20 }
 0x188   :  { %v698_v21 = vpop.trf.xlu0 }
 0x189   :  { %714 = vst [vmem:[%s1257_s3 + $0x10] sm:$0xff] %v698_v21 }
 0x18c   :  { %v699_v3 = vpop.trf.xlu0 }
 0x18d   :  { %715 = vst [vmem:[%s1257_s3 + $0x18] sm:$0xff] %v699_v3 }
 0x190   :  { %v700_v22 = vpop.trf.xlu0 }
 0x191   :  { %716 = vst [vmem:[%s1257_s3 + $0x20] sm:$0xff] %v700_v22 }
 0x194   :  { %v701_v23 = vpop.trf.xlu0 }
 0x195   :  { %717 = vst [vmem:[%s1257_s3 + $0x28] sm:$0xff] %v701_v23 }
 0x198   :  { %v702_v24 = vpop.trf.xlu0 }
 0x199   :  { %718 = vst [vmem:[%s1257_s3 + $0x30] sm:$0xff] %v702_v24 }
 0x19c   :  { %v703_v25 = vpop.trf.xlu0 }
 0x19d   :  { %719 = vst [vmem:[%s1257_s3 + $0x38] sm:$0xff] %v703_v25 }

// kernel: cnn_encoder_forward.5
= control target key start
LH: loop header
LB: loop body
LE: loop exit
PB: predicated region body
PF: predicated region fallthrough
CT: control target
= control target key end

     0   :  { %s1650_s1 = inlined_call_operand.vmem [shape: bf16[640,64], index: 1, kind: input, shape index: {}]   ;;  %s1651_s0 = inlined_call_operand.vmem [shape: bf16[128,640], index: 0, kind: input, shape index: {}]   ;;  %s1652_s2 = inlined_call_operand.vmem [shape: f32[1,64], index: 2, kind: input, shape index: {}]   ;;  %s1653_s3 = inlined_call_operand.vmem [shape: f32[64,128], index: 3, kind: output, shape index: {}]  }
   0x1   :  { %v1222_v0 = vld [vmem:[%s1650_s1 + $0x40] sm:$0xff]   ;;  %v1226_v4 = vld [vmem:[%s1650_s1 + $0x48] sm:$0xff]   ;;  %v1230_v8 = vld [vmem:[%s1650_s1 + $0x50] sm:$0xff]  }
   0x2   :  { %v1223_v1 = vld [vmem:[%s1650_s1 + $0xc0] sm:$0xff]   ;;  %1030 = vmatprep.subr.bf16.mxu0 %v1222_v0  ;;  %v1227_v5 = vld [vmem:[%s1650_s1 + $0xc8] sm:$0xff]   ;;  %v1231_v9 = vld [vmem:[%s1650_s1 + $0xd0] sm:$0xff]  }
   0x3   :  { %v1224_v2 = vld [vmem:[%s1650_s1] sm:$0xff]   ;;  %1094 = vmatprep.subr.bf16.mxu1 %v1223_v1  ;;  %v1228_v6 = vld [vmem:[%s1650_s1 + $0x8] sm:$0xff]   ;;  %v1232_v10 = vld [vmem:[%s1650_s1 + $0x10] sm:$0xff]  }
   0x4   :  { %v1225_v3 = vld [vmem:[%s1650_s1 + $0x80] sm:$0xff]   ;;  %1031 = vmatpush3.bf16.msra.mxu0 %v1224_v2  ;;  %v1229_v7 = vld [vmem:[%s1650_s1 + $0x88] sm:$0xff]   ;;  %v1233_v11 = vld [vmem:[%s1650_s1 + $0x90] sm:$0xff]  }
   0x5   :  { %1095 = vmatpush3.bf16.msra.mxu1 %v1225_v3  ;;  %1032 = vmatprep.subr.bf16.mxu0 %v1226_v4  ;;  %v1234_v12 = vld [vmem:[%s1650_s1 + $0x58] sm:$0xff]   ;;  %v1238_v16 = vld [vmem:[%s1650_s1 + $0x60] sm:$0xff]   ;;  %v1242_v20 = vld [vmem:[%s1650_s1 + $0x68] sm:$0xff]  }
   0x6   :  { %1096 = vmatprep.subr.bf16.mxu1 %v1227_v5  ;;  %v1235_v13 = vld [vmem:[%s1650_s1 + $0xd8] sm:$0xff]   ;;  %v1239_v17 = vld [vmem:[%s1650_s1 + $0xe0] sm:$0xff]   ;;  %v1243_v21 = vld [vmem:[%s1650_s1 + $0xe8] sm:$0xff]  }
   0x7   :  { %v1236_v14 = vld [vmem:[%s1650_s1 + $0x18] sm:$0xff]   ;;  %v1240_v18 = vld [vmem:[%s1650_s1 + $0x20] sm:$0xff]   ;;  %v1244_v22 = vld [vmem:[%s1650_s1 + $0x28] sm:$0xff]  }
   0x8   :  { %1033 = vmatpush3.bf16.msra.mxu0 %v1228_v6  ;;  %v1237_v15 = vld [vmem:[%s1650_s1 + $0x98] sm:$0xff]   ;;  %v1241_v19 = vld [vmem:[%s1650_s1 + $0xa0] sm:$0xff]   ;;  %v1245_v23 = vld [vmem:[%s1650_s1 + $0xa8] sm:$0xff]  }
   0x9   :  { %1097 = vmatpush3.bf16.msra.mxu1 %v1229_v7  ;;  %1034 = vmatprep.subr.bf16.mxu0 %v1230_v8  ;;  %v1246_v24 = vld [vmem:[%s1650_s1 + $0x70] sm:$0xff]   ;;  %v1250_v28 = vld [vmem:[%s1650_s1 + $0x78] sm:$0xff]   ;;  %v1259_v35 = vld [vmem:[%s1651_s0 + $0xc] ss:$20 sps:$4 sm:$0xff]  }
   0xa   :  { %1098 = vmatprep.subr.bf16.mxu1 %v1231_v9  ;;  %v1247_v25 = vld [vmem:[%s1650_s1 + $0xf0] sm:$0xff]   ;;  %v1251_v29 = vld [vmem:[%s1650_s1 + $0xf8] sm:$0xff]   ;;  %v1260_v36 = vld [vmem:[%s1650_s1 + $0x100] sm:$0xff]   ;;  %727 = vmatprep.mubr.bf16.mxu1 %v1259_v35 }
   0xb   :  { %v1248_v26 = vld [vmem:[%s1650_s1 + $0x30] sm:$0xff]   ;;  %v1252_v30 = vld [vmem:[%s1650_s1 + $0x38] sm:$0xff]   ;;  %v1261_v37 = vld [vmem:[%s1651_s0 + $0x2c] ss:$20 sps:$4 sm:$0xff]  }
   0xc   :  { %1035 = vmatpush3.bf16.msra.mxu0 %v1232_v10  ;;  %v1249_v27 = vld [vmem:[%s1650_s1 + $0xb0] sm:$0xff]   ;;  %v1253_v31 = vld [vmem:[%s1650_s1 + $0xb8] sm:$0xff]   ;;  %v1267_v39 = vld [vmem:[%s1650_s1 + $0x108] sm:$0xff]  }
   0xd   :  { %1099 = vmatpush3.bf16.msra.mxu1 %v1233_v11  ;;  %1036 = vmatprep.subr.bf16.mxu0 %v1234_v12  ;;  %v1254_v32 = vld [vmem:[%s1651_s0] ss:$20 sps:$4 sm:$0xff]   ;;  %v1256_v33 = vld [vmem:[%s1651_s0 + $0x4] ss:$20 sps:$4 sm:$0xff]   ;;  %v1257_v34 = vld [vmem:[%s1651_s0 + $0x8] ss:$20 sps:$4 sm:$0xff]  }
   0xe   :  { %1100 = vmatprep.subr.bf16.mxu1 %v1235_v13  ;;  %630 = vmatprep.mubr.bf16.mxu0 %v1256_v33  ;;  %v1263_v38 = vld [vmem:[%s1651_s0 + $0x34] ss:$20 sps:$4 sm:$0xff]   ;;  %v1266_v41 = vld [vmem:[%s1651_s0 + $0x30] ss:$20 sps:$4 sm:$0xff]   ;;  %v1281_v45 = vld [vmem:[%s1650_s1 + $0x118] sm:$0xff]  }
   0xf   :  { %v1265_v40 = vld [vmem:[%s1651_s0 + $0x28] ss:$20 sps:$4 sm:$0xff]   ;;  %v1274_v44 = vld [vmem:[%s1650_s1 + $0x110] sm:$0xff]   ;;  %v1273_v47 = vld [vmem:[%s1651_s0 + $0x58] ss:$20 sps:$4 sm:$0xff]  }
  0x10   :  { %1037 = vmatpush3.bf16.msra.mxu0 %v1236_v14  ;;  %v1268_v42 = vld [vmem:[%s1651_s0 + $0x54] ss:$20 sps:$4 sm:$0xff]   ;;  %v1270_v43 = vld [vmem:[%s1651_s0 + $0x5c] ss:$20 sps:$4 sm:$0xff]   ;;  %v1277_v49 = vld [vmem:[%s1651_s0 + $0x84] ss:$20 sps:$4 sm:$0xff]  }
  0x11   :  { %1101 = vmatpush3.bf16.msra.mxu1 %v1237_v15  ;;  %1038 = vmatprep.subr.bf16.mxu0 %v1238_v16  ;;  %v1272_v46 = vld [vmem:[%s1651_s0 + $0x50] ss:$20 sps:$4 sm:$0xff]   ;;  %v1295_v51 = vld [vmem:[%s1650_s1 + $0x128] sm:$0xff]   ;;  %v1280_v53 = vld [vmem:[%s1651_s0 + $0x80] ss:$20 sps:$4 sm:$0xff]  }
  0x12   :  { %1102 = vmatprep.subr.bf16.mxu1 %v1239_v17  ;;  %v1275_v48 = vld [vmem:[%s1651_s0 + $0x7c] ss:$20 sps:$4 sm:$0xff]   ;;  %v1288_v50 = vld [vmem:[%s1650_s1 + $0x120] sm:$0xff]   ;;  %v1279_v52 = vld [vmem:[%s1651_s0 + $0x78] ss:$20 sps:$4 sm:$0xff]  }
  0x13   :  { %v1282_v54 = vld [vmem:[%s1651_s0 + $0xa4] ss:$20 sps:$4 sm:$0xff]   ;;  %v1302_v55 = vld [vmem:[%s1650_s1 + $0x130] sm:$0xff]   ;;  %v1284_v56 = vld [vmem:[%s1651_s0 + $0xac] ss:$20 sps:$4 sm:$0xff]  }
  0x14   :  { %1039 = vmatpush3.bf16.msra.mxu0 %v1240_v18  ;;  %v1309_v57 = vld [vmem:[%s1650_s1 + $0x138] sm:$0xff]   ;;  %v1286_v58 = vld [vmem:[%s1651_s0 + $0xa0] ss:$20 sps:$4 sm:$0xff]   ;;  %v1294_v63 = vld [vmem:[%s1651_s0 + $0xd0] ss:$20 sps:$4 sm:$0xff]  }
  0x15   :  { %1103 = vmatpush3.bf16.msra.mxu1 %v1241_v19  ;;  %1040 = vmatprep.subr.bf16.mxu0 %v1242_v20  ;;  %v1287_v59 = vld [vmem:[%s1651_s0 + $0xa8] ss:$20 sps:$4 sm:$0xff]   ;;  %v1289_v60 = vld [vmem:[%s1651_s0 + $0xcc] ss:$20 sps:$4 sm:$0xff]   ;;  %v1300_v2 = vld [vmem:[%s1651_s0 + $0xf0] ss:$20 sps:$4 sm:$0xff]  }
  0x16   :  { %1104 = vmatprep.subr.bf16.mxu1 %v1243_v21  ;;  %v1291_v61 = vld [vmem:[%s1651_s0 + $0xd4] ss:$20 sps:$4 sm:$0xff]   ;;  %v1298_v1 = vld [vmem:[%s1651_s0 + $0xfc] ss:$20 sps:$4 sm:$0xff]   ;;  %v1301_v3 = vld [vmem:[%s1651_s0 + $0xf8] ss:$20 sps:$4 sm:$0xff]  }
  0x17   :  { %v1293_v62 = vld [vmem:[%s1651_s0 + $0xc8] ss:$20 sps:$4 sm:$0xff]   ;;  %v1305_v5 = vld [vmem:[%s1651_s0 + $0x124] ss:$20 sps:$4 sm:$0xff]   ;;  %v1308_v7 = vld [vmem:[%s1651_s0 + $0x120] ss:$20 sps:$4 sm:$0xff]  }
  0x18   :  { %1041 = vmatpush3.bf16.msra.mxu0 %v1244_v22  ;;  %v1296_v0 = vld [vmem:[%s1651_s0 + $0xf4] ss:$20 sps:$4 sm:$0xff]   ;;  %v1303_v4 = vld [vmem:[%s1651_s0 + $0x11c] ss:$20 sps:$4 sm:$0xff]   ;;  %v1307_v6 = vld [vmem:[%s1651_s0 + $0x118] ss:$20 sps:$4 sm:$0xff]  }
  0x19   :  { %1105 = vmatpush3.bf16.msra.mxu1 %v1245_v23  ;;  %1042 = vmatprep.subr.bf16.mxu0 %v1246_v24  ;;  %v1310_v8 = vld [vmem:[%s1651_s0 + $0x10] ss:$20 sps:$4 sm:$0xff]   ;;  %v1312_v10 = vld [vmem:[%s1651_s0 + $0x38] ss:$20 sps:$4 sm:$0xff]   ;;  %v1314_v12 = vld [vmem:[%s1651_s0 + $0x60] ss:$20 sps:$4 sm:$0xff]  }
  0x1a   :  { %1106 = vmatprep.subr.bf16.mxu1 %v1247_v25  ;;  %v1311_v9 = vld [vmem:[%s1651_s0 + $0xb0] ss:$20 sps:$4 sm:$0xff]   ;;  %v1313_v11 = vld [vmem:[%s1651_s0 + $0xd8] ss:$20 sps:$4 sm:$0xff]   ;;  %v1315_v13 = vld [vmem:[%s1651_s0 + $0x100] ss:$20 sps:$4 sm:$0xff]  }
  0x1b   :  { %v1316_v14 = vld [vmem:[%s1651_s0 + $0x88] ss:$20 sps:$4 sm:$0xff]   ;;  %v1581_v17 = vld [vmem:[%s1652_s2] ss:$0 sm:$0xff] }
  0x1c   :  { %1043 = vmatpush3.bf16.msra.mxu0 %v1248_v26  ;;  %v1317_v15 = vld [vmem:[%s1651_s0 + $0x128] ss:$20 sps:$4 sm:$0xff]  }
  0x1d   :  { %1107 = vmatpush3.bf16.msra.mxu1 %v1249_v27  ;;  %1044 = vmatprep.subr.bf16.mxu0 %v1250_v28 }
  0x1e   :  { %1108 = vmatprep.subr.bf16.mxu1 %v1251_v29 }
  0x20   :  { %1045 = vmatpush3.bf16.msra.mxu0 %v1252_v30 }
  0x21   :  { %1109 = vmatpush3.bf16.msra.mxu1 %v1253_v31  ;;  %1174 = vmatprep.subr.bf16.mxu0 %v1260_v36 }
  0x22   :  { %1206 = vmatprep.subr.bf16.mxu1 %v1260_v36 }
  0x23   :  { %631 = vmatmul.mubr.bf16.vlgmr.msra.gmra.mrb[0].mxu0 %v1254_v32 }
  0x24   :  { %728 = vmatmul.mubr.bf16.vlgmr.msra.gmra.mrb[0].mxu1 %v1257_v34  ;;  %1175 = vmatpush3.bf16.msra.mxu0 %v1260_v36 }
  0x25   :  { %638 = vmatprep.mubr.bf16.mxu0 %v1261_v37  ;;  %735 = vmatprep.mubr.bf16.mxu1 %v1263_v38 }
  0x26   :  { %1214 = vmatpush3.bf16.msra.mxu1 %v1260_v36  ;;  %1176 = vmatprep.subr.bf16.mxu0 %v1267_v39 }
  0x27   :  { %1207 = vmatprep.subr.bf16.mxu1 %v1267_v39 }
  0x28   :  { %1177 = vmatpush3.bf16.msra.mxu0 %v1267_v39 }
  0x29   :  { %1178 = vmatprep.subr.bf16.mxu0 %v1274_v44 }
  0x2a   :  { %1215 = vmatpush3.bf16.msra.mxu1 %v1267_v39 }
  0x2b   :  { %639 = vmatmul.mubr.bf16.gmra.mrb[4].mxu0 %v1265_v40  ;;  %1208 = vmatprep.subr.bf16.mxu1 %v1274_v44 }
  0x2c   :  { %736 = vmatmul.mubr.bf16.gmra.mrb[4].mxu1 %v1266_v41  ;;  %646 = vmatprep.mubr.bf16.mxu0 %v1268_v42 }
  0x2d   :  { %743 = vmatprep.mubr.bf16.mxu1 %v1270_v43  ;;  %1179 = vmatpush3.bf16.msra.mxu0 %v1274_v44 }
  0x2e   :  { %1180 = vmatprep.subr.bf16.mxu0 %v1281_v45  ;;  %1216 = vmatpush3.bf16.msra.mxu1 %v1274_v44 }
  0x2f   :  { %1209 = vmatprep.subr.bf16.mxu1 %v1281_v45 }
  0x31   :  { %1181 = vmatpush3.bf16.msra.mxu0 %v1281_v45 }
  0x32   :  { %1182 = vmatprep.subr.bf16.mxu0 %v1288_v50  ;;  %1217 = vmatpush3.bf16.msra.mxu1 %v1281_v45 }
  0x33   :  { %647 = vmatmul.mubr.bf16.gmra.mrb[8].mxu0 %v1272_v46  ;;  %1210 = vmatprep.subr.bf16.mxu1 %v1288_v50 }
  0x34   :  { %744 = vmatmul.mubr.bf16.gmra.mrb[8].mxu1 %v1273_v47  ;;  %654 = vmatprep.mubr.bf16.mxu0 %v1275_v48 }
  0x35   :  { %751 = vmatprep.mubr.bf16.mxu1 %v1277_v49  ;;  %1183 = vmatpush3.bf16.msra.mxu0 %v1288_v50 }
  0x36   :  { %1184 = vmatprep.subr.bf16.mxu0 %v1295_v51  ;;  %1218 = vmatpush3.bf16.msra.mxu1 %v1288_v50 }
  0x37   :  { %1211 = vmatprep.subr.bf16.mxu1 %v1295_v51 }
  0x39   :  { %1185 = vmatpush3.bf16.msra.mxu0 %v1295_v51 }
  0x3a   :  { %1186 = vmatprep.subr.bf16.mxu0 %v1302_v55  ;;  %1219 = vmatpush3.bf16.msra.mxu1 %v1295_v51 }
  0x3b   :  { %655 = vmatmul.mubr.bf16.gmra.mrb[12].mxu0 %v1279_v52  ;;  %1212 = vmatprep.subr.bf16.mxu1 %v1302_v55 }
  0x3c   :  { %752 = vmatmul.mubr.bf16.gmra.mrb[12].mxu1 %v1280_v53  ;;  %662 = vmatprep.mubr.bf16.mxu0 %v1282_v54 }
  0x3d   :  { %759 = vmatprep.mubr.bf16.mxu1 %v1284_v56  ;;  %1187 = vmatpush3.bf16.msra.mxu0 %v1302_v55 }
  0x3e   :  { %1188 = vmatprep.subr.bf16.mxu0 %v1309_v57  ;;  %1220 = vmatpush3.bf16.msra.mxu1 %v1302_v55 }
  0x3f   :  { %1213 = vmatprep.subr.bf16.mxu1 %v1309_v57 }
  0x41   :  { %1189 = vmatpush3.bf16.msra.mxu0 %v1309_v57 }
  0x42   :  { %1221 = vmatpush3.bf16.msra.mxu1 %v1309_v57 }
  0x43   :  { %663 = vmatmul.mubr.bf16.gmra.mrb[16].mxu0 %v1286_v58 }
  0x44   :  { %760 = vmatmul.mubr.bf16.gmra.mrb[16].mxu1 %v1287_v59  ;;  %670 = vmatprep.mubr.bf16.mxu0 %v1289_v60 }
  0x45   :  { %767 = vmatprep.mubr.bf16.mxu1 %v1291_v61 }
  0x4b   :  { %671 = vmatmul.mubr.bf16.gmra.mrb[20].mxu0 %v1293_v62 }
  0x4c   :  { %768 = vmatmul.mubr.bf16.gmra.mrb[20].mxu1 %v1294_v63  ;;  %678 = vmatprep.mubr.bf16.mxu0 %v1296_v0 }
  0x4d   :  { %775 = vmatprep.mubr.bf16.mxu1 %v1298_v1 }
  0x53   :  { %679 = vmatmul.mubr.bf16.gmra.mrb[24].mxu0 %v1300_v2 }
  0x54   :  { %776 = vmatmul.mubr.bf16.gmra.mrb[24].mxu1 %v1301_v3  ;;  %686 = vmatprep.mubr.bf16.mxu0 %v1303_v4 }
  0x55   :  { %783 = vmatprep.mubr.bf16.mxu1 %v1305_v5 }
  0x5b   :  { %687 = vmatmul.mubr.bf16.gmra.mrb[28].mxu0 %v1307_v6 }
  0x5c   :  { %784 = vmatmul.mubr.bf16.gmra.mrb[28].mxu1 %v1308_v7  ;;  %1190 = vmatprep.mubr.bf16.mxu0 %v1310_v8 }
  0x5d   :  { %1198 = vmatprep.mubr.bf16.mxu1 %v1311_v9 }
  0x63   :  { %1191 = vmatmul.mubr.bf16.vlgmr.msra.gmra.mrb[32].mxu0 %v1312_v10 }
  0x64   :  { %1199 = vmatmul.mubr.bf16.vlgmr.msra.gmra.mrb[32].mxu1 %v1313_v11  ;;  %1194 = vmatprep.mubr.bf16.mxu0 %v1314_v12 }
  0x65   :  { %1202 = vmatprep.mubr.bf16.mxu1 %v1315_v13 }
  0x6b   :  { %1195 = vmatmul.mubr.bf16.gmra.mrb[36].mxu0 %v1316_v14 }
  0x6c   :  { %1203 = vmatmul.mubr.bf16.gmra.mrb[36].mxu1 %v1317_v15 }
  0xf6   :  { %v1046_v16 = vpop.f32.mrb[0].mxu0 }
  0xf7   :  { %v1047_v18 = vpop.f32.mrb[1].mxu0  ;;  %v1110_v19 = vpop.f32.mrb[0].mxu1 }
  0xf8   :  { %v1048_v20 = vadd.f32 %v1047_v18, %v1046_v16  ;;  %v1049_v21 = vpop.f32.mrb[2].mxu0  ;;  %v1111_v22 = vpop.f32.mrb[1].mxu1 }
  0xf9   :  { %v1050_v23 = vpop.f32.mrb[3].mxu0  ;;  %v1112_v24 = vadd.f32 %v1111_v22, %v1110_v19  ;;  %v1113_v25 = vpop.f32.mrb[2].mxu1 }
  0xfa   :  { %v633_v26 = vadd.f32 %v1048_v20, %v1581_v17  ;;  %v1051_v27 = vadd.f32 %v1050_v23, %v1049_v21  ;;  %v1114_v28 = vpop.f32.mrb[3].mxu1 }
  0xfb   :  { %v1115_v29 = vadd.f32 %v1114_v28, %v1113_v25 }
  0xfc   :  { %v636_v30 = vadd.f32 %v1051_v27, %v1581_v17  ;;  %v1585_v31 = vadd.f32 %v1112_v24, %v633_v26 }
  0xfe   :  { %v1052_v32 = vpop.f32.mrb[4].mxu0  ;;  %v1587_v33 = vadd.f32 %v1115_v29, %v636_v30 }
  0xff   :  { %v1053_v34 = vpop.f32.mrb[5].mxu0  ;;  %v1116_v35 = vpop.f32.mrb[4].mxu1 }
 0x100   :  { %v1054_v36 = vadd.f32 %v1053_v34, %v1052_v32  ;;  %v1055_v37 = vpop.f32.mrb[6].mxu0  ;;  %v1117_v38 = vpop.f32.mrb[5].mxu1 }
 0x101   :  { %v1056_v39 = vpop.f32.mrb[7].mxu0  ;;  %v1118_v40 = vadd.f32 %v1117_v38, %v1116_v35  ;;  %v1119_v41 = vpop.f32.mrb[6].mxu1 }
 0x102   :  { %v641_v42 = vadd.f32 %v1054_v36, %v1581_v17  ;;  %v1057_v43 = vadd.f32 %v1056_v39, %v1055_v37  ;;  %v1120_v44 = vpop.f32.mrb[7].mxu1 }
 0x103   :  { %v1121_v45 = vadd.f32 %v1120_v44, %v1119_v41 }
 0x104   :  { %v644_v46 = vadd.f32 %v1057_v43, %v1581_v17  ;;  %v1591_v47 = vadd.f32 %v1118_v40, %v641_v42 }
 0x106   :  { %v1058_v48 = vpop.f32.mrb[8].mxu0  ;;  %v1593_v49 = vadd.f32 %v1121_v45, %v644_v46 }
 0x107   :  { %v1059_v50 = vpop.f32.mrb[9].mxu0  ;;  %v1122_v51 = vpop.f32.mrb[8].mxu1 }
 0x108   :  { %v1060_v52 = vadd.f32 %v1059_v50, %v1058_v48  ;;  %v1061_v53 = vpop.f32.mrb[10].mxu0  ;;  %v1123_v54 = vpop.f32.mrb[9].mxu1 }
 0x109   :  { %v1062_v55 = vpop.f32.mrb[11].mxu0  ;;  %v1124_v56 = vadd.f32 %v1123_v54, %v1122_v51  ;;  %v1125_v57 = vpop.f32.mrb[10].mxu1 }
 0x10a   :  { %v649_v58 = vadd.f32 %v1060_v52, %v1581_v17  ;;  %v1063_v59 = vadd.f32 %v1062_v55, %v1061_v53  ;;  %v1126_v60 = vpop.f32.mrb[11].mxu1 }
 0x10b   :  { %v1127_v61 = vadd.f32 %v1126_v60, %v1125_v57 }
 0x10c   :  { %v652_v62 = vadd.f32 %v1063_v59, %v1581_v17  ;;  %v1597_v63 = vadd.f32 %v1124_v56, %v649_v58 }
 0x10e   :  { %v1064_v0 = vpop.f32.mrb[12].mxu0  ;;  %v1599_v1 = vadd.f32 %v1127_v61, %v652_v62 }
 0x10f   :  { %v1065_v2 = vpop.f32.mrb[13].mxu0  ;;  %v1128_v3 = vpop.f32.mrb[12].mxu1 }
 0x110   :  { %v1066_v4 = vadd.f32 %v1065_v2, %v1064_v0  ;;  %v1067_v5 = vpop.f32.mrb[14].mxu0  ;;  %v1129_v6 = vpop.f32.mrb[13].mxu1 }
 0x111   :  { %v1068_v7 = vpop.f32.mrb[15].mxu0  ;;  %v1130_v8 = vadd.f32 %v1129_v6, %v1128_v3  ;;  %v1131_v9 = vpop.f32.mrb[14].mxu1 }
 0x112   :  { %v657_v10 = vadd.f32 %v1066_v4, %v1581_v17  ;;  %v1069_v11 = vadd.f32 %v1068_v7, %v1067_v5  ;;  %v1132_v12 = vpop.f32.mrb[15].mxu1 }
 0x113   :  { %v1133_v13 = vadd.f32 %v1132_v12, %v1131_v9 }
 0x114   :  { %v660_v14 = vadd.f32 %v1069_v11, %v1581_v17  ;;  %v1603_v15 = vadd.f32 %v1130_v8, %v657_v10 }
 0x116   :  { %v1070_v16 = vpop.f32.mrb[16].mxu0  ;;  %v1605_v18 = vadd.f32 %v1133_v13, %v660_v14 }
 0x117   :  { %v1071_v19 = vpop.f32.mrb[17].mxu0  ;;  %v1134_v20 = vpop.f32.mrb[16].mxu1 }
 0x118   :  { %v1072_v21 = vadd.f32 %v1071_v19, %v1070_v16  ;;  %v1073_v22 = vpop.f32.mrb[18].mxu0  ;;  %v1135_v23 = vpop.f32.mrb[17].mxu1 }
 0x119   :  { %v1074_v24 = vpop.f32.mrb[19].mxu0  ;;  %v1136_v25 = vadd.f32 %v1135_v23, %v1134_v20  ;;  %v1137_v26 = vpop.f32.mrb[18].mxu1 }
 0x11a   :  { %v665_v27 = vadd.f32 %v1072_v21, %v1581_v17  ;;  %v1075_v28 = vadd.f32 %v1074_v24, %v1073_v22  ;;  %v1138_v29 = vpop.f32.mrb[19].mxu1 }
 0x11b   :  { %v1139_v30 = vadd.f32 %v1138_v29, %v1137_v26 }
 0x11c   :  { %v668_v32 = vadd.f32 %v1075_v28, %v1581_v17  ;;  %v762_v34 = vadd.f32 %v1136_v25, %v665_v27 }
 0x11e   :  { %v1076_v35 = vpop.f32.mrb[20].mxu0  ;;  %v1609_v36 = vadd.f32 %v1139_v30, %v668_v32 }
 0x11f   :  { %v1077_v37 = vpop.f32.mrb[21].mxu0  ;;  %v1140_v38 = vpop.f32.mrb[20].mxu1 }
 0x120   :  { %v1078_v39 = vadd.f32 %v1077_v37, %v1076_v35  ;;  %v1079_v40 = vpop.f32.mrb[22].mxu0  ;;  %v1141_v41 = vpop.f32.mrb[21].mxu1 }
 0x121   :  { %v1080_v42 = vpop.f32.mrb[23].mxu0  ;;  %v1142_v43 = vadd.f32 %v1141_v41, %v1140_v38  ;;  %v1143_v44 = vpop.f32.mrb[22].mxu1 }
 0x122   :  { %v673_v45 = vadd.f32 %v1078_v39, %v1581_v17  ;;  %v1081_v46 = vadd.f32 %v1080_v42, %v1079_v40  ;;  %v1144_v48 = vpop.f32.mrb[23].mxu1 }
 0x123   :  { %v1145_v50 = vadd.f32 %v1144_v48, %v1143_v44 }
 0x124   :  { %v676_v51 = vadd.f32 %v1081_v46, %v1581_v17  ;;  %v770_v52 = vadd.f32 %v1142_v43, %v673_v45 }
 0x126   :  { %v1082_v53 = vpop.f32.mrb[24].mxu0  ;;  %v773_v54 = vadd.f32 %v1145_v50, %v676_v51 }
 0x127   :  { %v1083_v55 = vpop.f32.mrb[25].mxu0  ;;  %v1146_v56 = vpop.f32.mrb[24].mxu1 }
 0x128   :  { %v1084_v57 = vadd.f32 %v1083_v55, %v1082_v53  ;;  %v1085_v58 = vpop.f32.mrb[26].mxu0  ;;  %v1147_v59 = vpop.f32.mrb[25].mxu1 }
 0x129   :  { %v1086_v60 = vpop.f32.mrb[27].mxu0  ;;  %v1148_v61 = vadd.f32 %v1147_v59, %v1146_v56  ;;  %v1149_v62 = vpop.f32.mrb[26].mxu1 }
 0x12a   :  { %v681_v0 = vadd.f32 %v1084_v57, %v1581_v17  ;;  %v1087_v2 = vadd.f32 %v1086_v60, %v1085_v58  ;;  %v1150_v3 = vpop.f32.mrb[27].mxu1 }
 0x12b   :  { %v1151_v4 = vadd.f32 %v1150_v3, %v1149_v62 }
 0x12c   :  { %v684_v5 = vadd.f32 %v1087_v2, %v1581_v17  ;;  %v778_v6 = vadd.f32 %v1148_v61, %v681_v0 }
 0x12e   :  { %v1088_v7 = vpop.f32.mrb[28].mxu0  ;;  %v781_v8 = vadd.f32 %v1151_v4, %v684_v5 }
 0x12f   :  { %v1089_v9 = vpop.f32.mrb[29].mxu0  ;;  %v1152_v10 = vpop.f32.mrb[28].mxu1 }
 0x130   :  { %v1090_v11 = vadd.f32 %v1089_v9, %v1088_v7  ;;  %v1091_v12 = vpop.f32.mrb[30].mxu0  ;;  %v1153_v13 = vpop.f32.mrb[29].mxu1 }
 0x131   :  { %v1092_v14 = vpop.f32.mrb[31].mxu0  ;;  %v1154_v16 = vadd.f32 %v1153_v13, %v1152_v10  ;;  %v1155_v19 = vpop.f32.mrb[30].mxu1 }
 0x132   :  { %v689_v20 = vadd.f32 %v1090_v11, %v1581_v17  ;;  %v1093_v21 = vadd.f32 %v1092_v14, %v1091_v12  ;;  %v1156_v22 = vpop.f32.mrb[31].mxu1 }
 0x133   :  { %v1157_v23 = vadd.f32 %v1156_v22, %v1155_v19 }
 0x134   :  { %v692_v24 = vadd.f32 %v1093_v21, %v1581_v17  ;;  %v786_v25 = vadd.f32 %v1154_v16, %v689_v20 }
 0x136   :  { %v1192_v26 = vpop.f32.mrb[32].mxu0  ;;  %v789_v27 = vadd.f32 %v1157_v23, %v692_v24 }
 0x137   :  { %v835_v28 = vadd.f32 %v1192_v26, %v1591_v47  ;;  %v1200_v29 = vpop.f32.mrb[32].mxu1  ;;  %v826_v30 = vpop.f32.mrb[33].mxu0 }
 0x138   :  { %v867_v32 = vadd.f32 %v1200_v29, %v770_v52  ;;  %v858_v35 = vpop.f32.mrb[33].mxu1  ;;  %v1193_v37 = vpop.f32.mrb[34].mxu0  ;;  %v827_v38 = vadd.f32 %v826_v30, %v1585_v31 }
 0x139   :  { %v859_v39 = vadd.f32 %v858_v35, %v762_v34  ;;  %v838_v40 = vadd.f32 %v1193_v37, %v1593_v49  ;;  %v1201_v41 = vpop.f32.mrb[34].mxu1  ;;  %v829_v42 = vpop.f32.mrb[35].mxu0  ;;  %v891_v57 = vmax.f32 %v835_v28, 0.0 }
 0x13a   :  { %v870_v43 = vadd.f32 %v1201_v41, %v773_v54  ;;  %v830_v17 = vadd.f32 %v829_v42, %v1587_v33  ;;  %v861_v44 = vpop.f32.mrb[35].mxu1  ;;  %v889_v45 = vmax.f32 %v827_v38, 0.0  ;;  %v899_v3 = vmax.f32 %v867_v32, 0.0 }
 0x13b   :  { %v862_v46 = vadd.f32 %v861_v44, %v1609_v36 }
 0x13c   :  { %905 = vxpose.xlu0.b32.start [1/16] (narrow) %v889_v45, 64  ;;  %v890_v47 = vmax.f32 %v830_v17, 0.0 }
 0x13d   :  { %v898_v2 = vmax.f32 %v862_v46, 0.0 }
 0x13e   :  { %v1196_v48 = vpop.f32.mrb[36].mxu0 }
 0x13f   :  { %v851_v50 = vadd.f32 %v1196_v48, %v1603_v15  ;;  %v1204_v51 = vpop.f32.mrb[36].mxu1  ;;  %v842_v52 = vpop.f32.mrb[37].mxu0  ;;  %v892_v15 = vmax.f32 %v838_v40, 0.0 }
 0x140   :  { %v883_v31 = vadd.f32 %v1204_v51, %v786_v25  ;;  %v843_v34 = vadd.f32 %v842_v52, %v1597_v63  ;;  %v874_v49 = vpop.f32.mrb[37].mxu1  ;;  %v1197_v53 = vpop.f32.mrb[38].mxu0  ;;  %906 = vxpose.xlu0.b32.cont [2/16] (narrow) %v890_v47, 64 }
 0x141   :  { %v875_v54 = vadd.f32 %v874_v49, %v778_v6  ;;  %v854_v33 = vadd.f32 %v1197_v53, %v1605_v18  ;;  %v1205_v55 = vpop.f32.mrb[38].mxu1  ;;  %v845_v56 = vpop.f32.mrb[39].mxu0  ;;  %v895_v62 = vmax.f32 %v851_v50, 0.0  ;;  %v897_v18 = vmax.f32 %v859_v39, 0.0 }
 0x142   :  { %v886_v36 = vadd.f32 %v1205_v55, %v789_v27  ;;  %v846_v58 = vadd.f32 %v845_v56, %v1599_v1  ;;  %v877_v59 = vpop.f32.mrb[39].mxu1  ;;  %v893_v61 = vmax.f32 %v843_v34, 0.0  ;;  %v900_v1 = vmax.f32 %v870_v43, 0.0 }
 0x143   :  { %v878_v60 = vadd.f32 %v877_v59, %v781_v8  ;;  %v896_v0 = vmax.f32 %v854_v33, 0.0  ;;  %v901_v4 = vmax.f32 %v875_v54, 0.0  ;;  %v903_v6 = vmax.f32 %v883_v31, 0.0 }
 0x144   :  { %907 = vxpose.xlu0.b32.cont [3/16] (narrow) %v891_v57, 64  ;;  %v894_v63 = vmax.f32 %v846_v58, 0.0  ;;  %v904_v7 = vmax.f32 %v886_v36, 0.0 }
 0x145   :  { %v902_v5 = vmax.f32 %v878_v60, 0.0 }
 0x148   :  { %908 = vxpose.xlu0.b32.cont [4/16] (narrow) %v892_v15, 64 }
 0x14c   :  { %909 = vxpose.xlu0.b32.cont [5/16] (narrow) %v893_v61, 64 }
 0x150   :  { %910 = vxpose.xlu0.b32.cont [6/16] (narrow) %v894_v63, 64 }
 0x154   :  { %911 = vxpose.xlu0.b32.cont [7/16] (narrow) %v895_v62, 64 }
 0x158   :  { %912 = vxpose.xlu0.b32.cont [8/16] (narrow) %v896_v0, 64 }
 0x15c   :  { %913 = vxpose.xlu0.b32.cont [9/16] (narrow) %v897_v18, 64 }
 0x160   :  { %914 = vxpose.xlu0.b32.cont [10/16] (narrow) %v898_v2, 64 }
 0x164   :  { %915 = vxpose.xlu0.b32.cont [11/16] (narrow) %v899_v3, 64 }
 0x168   :  { %916 = vxpose.xlu0.b32.cont [12/16] (narrow) %v900_v1, 64 }
 0x16c   :  { %917 = vxpose.xlu0.b32.cont [13/16] (narrow) %v901_v4, 64 }
 0x170   :  { %918 = vxpose.xlu0.b32.cont [14/16] (narrow) %v902_v5, 64 }
 0x174   :  { %919 = vxpose.xlu0.b32.cont [15/16] (narrow) %v903_v6, 64 }
 0x178   :  { %920 = vxpose.xlu0.b32.end [16/16] (narrow) %v904_v7, 64 }
 0x1bc   :  { %v921_v8 = vpop.trf.xlu0 }
 0x1bd   :  { %937 = vst [vmem:[%s1653_s3] sm:$0xff] %v921_v8 }
 0x1c0   :  { %v922_v9 = vpop.trf.xlu0 }
 0x1c1   :  { %938 = vst [vmem:[%s1653_s3 + $0x8] sm:$0xff] %v922_v9 }
 0x1c4   :  { %v923_v10 = vpop.trf.xlu0 }
 0x1c5   :  { %939 = vst [vmem:[%s1653_s3 + $0x10] sm:$0xff] %v923_v10 }
 0x1c8   :  { %v924_v11 = vpop.trf.xlu0 }
 0x1c9   :  { %940 = vst [vmem:[%s1653_s3 + $0x18] sm:$0xff] %v924_v11 }
 0x1cc   :  { %v925_v12 = vpop.trf.xlu0 }
 0x1cd   :  { %941 = vst [vmem:[%s1653_s3 + $0x20] sm:$0xff] %v925_v12 }
 0x1d0   :  { %v926_v13 = vpop.trf.xlu0 }
 0x1d1   :  { %942 = vst [vmem:[%s1653_s3 + $0x28] sm:$0xff] %v926_v13 }
 0x1d4   :  { %v927_v14 = vpop.trf.xlu0 }
 0x1d5   :  { %943 = vst [vmem:[%s1653_s3 + $0x30] sm:$0xff] %v927_v14 }
 0x1d8   :  { %v928_v16 = vpop.trf.xlu0 }
 0x1d9   :  { %944 = vst [vmem:[%s1653_s3 + $0x38] sm:$0xff] %v928_v16 }

</bundles_post_ra>
